<compile_context>
chip_gen: v7x
topology: tpu7x:2x2x1
jax: 0.10.0
libtpu: 0.0.40
codegen_flags: <defaults>
</compile_context>

<pallas_src>
import functools

import numpy as np
import jax
import jax.numpy as jnp
from jax.experimental import pallas as pl
from jax.experimental.pallas import tpu as pltpu


LANE = 128          # TPU lane width
ROW_TILE = 256      # rows per grid step


def _round_up(x, m):
    return ((x + m - 1) // m) * m


# ----------------------------------------------------------------------------
# Fused Mapping kernel: one row-tile through the whole MLP.
# ----------------------------------------------------------------------------
def _mapping_kernel(x_ref, w_in_ref, b_in_ref, w_hid_ref, b_hid_ref,
                    w_out_ref, b_out_ref, o_ref, *, res):
    x = x_ref[...]                                                  # (tm, Cp)

    # Linear(in -> hidden) + ReLU
    h = jnp.dot(x, w_in_ref[...], preferred_element_type=jnp.float32)
    h = jnp.maximum(h + b_in_ref[...], 0.0)

    # hidden_layers x (Linear(hidden -> hidden) + Tanh), statically unrolled
    num_hidden = w_hid_ref.shape[0]
    for l in range(num_hidden):
        h = jnp.dot(h, w_hid_ref[l], preferred_element_type=jnp.float32)
        h = jnp.tanh(h + b_hid_ref[l:l + 1, :])

    # Linear(hidden -> out)
    out = jnp.dot(h, w_out_ref[...], preferred_element_type=jnp.float32)
    out = out + b_out_ref[...]

    if res:
        out = jnp.clip(out + x, 0.0, 1.0)      # residual + clamp (res=True)
    else:
        out = jax.nn.sigmoid(out)              # res=False path appends Sigmoid

    o_ref[...] = out


# ----------------------------------------------------------------------------
# Wrapper: padding / tiling / pallas_call
# ----------------------------------------------------------------------------
def mapping_forward(params, x, *, res=True, tm=ROW_TILE):
    """Pallas implementation of Mapping.forward.

    params (PyTorch Linear layout):
      w_in  : (hidden, in)      b_in  : (hidden,)
      w_hid : (L, hidden, hidden)  b_hid : (L, hidden)
      w_out : (out, hidden)     b_out : (out,)
    """
    orig_shape = x.shape
    orig_dtype = x.dtype
    C = orig_shape[1]
    # faithful to torch: inp.view(-1, inp.shape[1]) (row-major reinterpretation)
    x2 = x.reshape(-1, C).astype(jnp.float32)
    M = x2.shape[0]

    w_in, b_in = params['w_in'], params['b_in']
    w_hid, b_hid = params['w_hid'], params['b_hid']
    w_out, b_out = params['w_out'], params['b_out']

    Hf = w_in.shape[0]
    Cout = w_out.shape[0]
    if res:
        assert Cout == C, "residual Mapping requires out_features == in_features"

    L = w_hid.shape[0]
    Cp = _round_up(max(C, Cout), LANE)       # padded feature width (lane-dense)
    Hp = _round_up(Hf, LANE)                 # padded hidden width
    Mp = _round_up(M, tm)                    # padded row count

    def pad2(a, r, c):
        return jnp.pad(a, ((0, r - a.shape[0]), (0, c - a.shape[1])))

    # Transpose to (in, out) matmul layout and zero-pad to lane multiples.
    w_in_p = pad2(w_in.T.astype(jnp.float32), Cp, Hp)                   # (Cp, Hp)
    b_in_p = jnp.pad(b_in.astype(jnp.float32), (0, Hp - Hf)).reshape(1, Hp)
    w_hid_p = jnp.pad(jnp.swapaxes(w_hid.astype(jnp.float32), 1, 2),
                      ((0, 0), (0, Hp - Hf), (0, Hp - Hf)))             # (L, Hp, Hp)
    b_hid_p = jnp.pad(b_hid.astype(jnp.float32), ((0, 0), (0, Hp - Hf)))  # (L, Hp)
    w_out_p = pad2(w_out.T.astype(jnp.float32), Hp, Cp)                 # (Hp, Cp)
    b_out_p = jnp.pad(b_out.astype(jnp.float32), (0, Cp - Cout)).reshape(1, Cp)

    x_p = jnp.pad(x2, ((0, Mp - M), (0, Cp - C)))                       # (Mp, Cp)

    kern = functools.partial(_mapping_kernel, res=res)
    y_p = pl.pallas_call(
        kern,
        out_shape=jax.ShapeDtypeStruct((Mp, Cp), jnp.float32),
        grid=(Mp // tm,),
        in_specs=[
            pl.BlockSpec((tm, Cp), lambda i: (i, 0)),        # activations (tiled rows)
            pl.BlockSpec((Cp, Hp), lambda i: (0, 0)),        # weights: VMEM-resident
            pl.BlockSpec((1, Hp), lambda i: (0, 0)),
            pl.BlockSpec((L, Hp, Hp), lambda i: (0, 0, 0)),
            pl.BlockSpec((L, Hp), lambda i: (0, 0)),
            pl.BlockSpec((Hp, Cp), lambda i: (0, 0)),
            pl.BlockSpec((1, Cp), lambda i: (0, 0)),
        ],
        out_specs=pl.BlockSpec((tm, Cp), lambda i: (i, 0)),
        compiler_params=pltpu.CompilerParams(
            dimension_semantics=("parallel",),               # megacore on v7x
            vmem_limit_bytes=32 * 1024 * 1024,               # safe on v5e/v6e/v7x
        ),
    )(x_p, w_in_p, b_in_p, w_hid_p, b_hid_p, w_out_p, b_out_p)

    y = y_p[:M, :Cout]
    return y.reshape(orig_shape).astype(orig_dtype)


# ----------------------------------------------------------------------------
# Pure-JAX reference (mirrors the PyTorch forward exactly)
# ----------------------------------------------------------------------------
def mapping_reference(params, x, *, res=True):
    dot = functools.partial(jnp.dot, precision=jax.lax.Precision.HIGHEST)
    orig_shape = x.shape
    C = orig_shape[1]
    inp = x.reshape(-1, C)
    h = jax.nn.relu(dot(inp, params['w_in'].T) + params['b_in'])
    for l in range(params['w_hid'].shape[0]):
        h = jnp.tanh(dot(h, params['w_hid'][l].T) + params['b_hid'][l])
    out = dot(h, params['w_out'].T) + params['b_out']
    if res:
        out = jnp.clip(out + inp, 0.0, 1.0)
    else:
        out = jax.nn.sigmoid(out)
    return out.reshape(orig_shape)


# ----------------------------------------------------------------------------
# Deterministic parameter init (PyTorch Linear layout / uniform bounds)
# ----------------------------------------------------------------------------
def init_params(key, in_features, hidden_features, hidden_layers, out_features):
    keys = jax.random.split(key, 2 * (hidden_layers + 2))

    def lin(kw, kb, fan_in, fan_out):
        bound = 1.0 / np.sqrt(fan_in)
        w = jax.random.uniform(kw, (fan_out, fan_in), jnp.float32, -bound, bound)
        b = jax.random.uniform(kb, (fan_out,), jnp.float32, -bound, bound)
        return w, b

    w_in, b_in = lin(keys[0], keys[1], in_features, hidden_features)
    whs, bhs = [], []
    for l in range(hidden_layers):
        w, b = lin(keys[2 + 2 * l], keys[3 + 2 * l], hidden_features, hidden_features)
        whs.append(w)
        bhs.append(b)
    w_out, b_out = lin(keys[-2], keys[-1], hidden_features, out_features)
    return {'w_in': w_in, 'b_in': b_in,
            'w_hid': jnp.stack(whs), 'b_hid': jnp.stack(bhs),
            'w_out': w_out, 'b_out': b_out}


# ----------------------------------------------------------------------------
if __name__ == "__main__":
    # Mapping(in_features=C, hidden_features=32, hidden_layers=3,
    #         out_features=C, res=True) applied to an NCHW activation tensor.
    B, C, H, W = 2, 4, 16, 16
    hidden_features, hidden_layers = 32, 3

    key = jax.random.PRNGKey(0)
    kp, kx = jax.random.split(key)
    params = init_params(kp, C, hidden_features, hidden_layers, C)
    x = jax.random.uniform(kx, (B, C, H, W), jnp.float32)

    fwd = jax.jit(functools.partial(mapping_forward, res=True))
    out = jax.block_until_ready(fwd(params, x))

    ref = jax.block_until_ready(mapping_reference(params, x, res=True))

    assert out.shape == (B, C, H, W), out.shape
    assert bool(jnp.all(jnp.isfinite(out)))
    assert float(jnp.min(out)) >= 0.0 and float(jnp.max(out)) <= 1.0  # clamp(0,1)
    max_err = float(jnp.max(jnp.abs(out - ref)))
    assert max_err < 5e-2, f"max abs error vs reference: {max_err}"
    print("KERNEL_OK")
</pallas_src>

<mosaic_0001>
module attributes {stable_mosaic.version = 11 : i64} {
  func.func @_mapping_kernel(%arg0: i32, %arg1: memref<256x128xf32, #tpu.memory_space<vmem>>, %arg2: memref<128x128xf32, #tpu.memory_space<vmem>>, %arg3: memref<1x128xf32, #tpu.memory_space<vmem>>, %arg4: memref<3x128x128xf32, #tpu.memory_space<vmem>>, %arg5: memref<3x128xf32, #tpu.memory_space<vmem>>, %arg6: memref<128x128xf32, #tpu.memory_space<vmem>>, %arg7: memref<1x128xf32, #tpu.memory_space<vmem>>, %arg8: memref<256x128xf32, #tpu.memory_space<vmem>>) attributes {dimension_semantics = [#tpu.dimension_semantics<parallel>], iteration_bounds = array<i64: 2>, scalar_prefetch = 0 : i64, scratch_operands = 0 : i64, tpu.core_type = #tpu.core_type<tc>, window_params = [{transform_indices = @transform_0, window_bounds = array<i64: 256, 128>}, {pipeline_mode = #tpu.pipeline_mode<synchronous>, transform_indices = @transform_1, window_bounds = array<i64: 128, 128>}, {pipeline_mode = #tpu.pipeline_mode<synchronous>, transform_indices = @transform_2, window_bounds = array<i64: 1, 128>}, {pipeline_mode = #tpu.pipeline_mode<synchronous>, transform_indices = @transform_3, window_bounds = array<i64: 3, 128, 128>}, {pipeline_mode = #tpu.pipeline_mode<synchronous>, transform_indices = @transform_4, window_bounds = array<i64: 3, 128>}, {pipeline_mode = #tpu.pipeline_mode<synchronous>, transform_indices = @transform_5, window_bounds = array<i64: 128, 128>}, {pipeline_mode = #tpu.pipeline_mode<synchronous>, transform_indices = @transform_6, window_bounds = array<i64: 1, 128>}, {transform_indices = @transform_7, window_bounds = array<i64: 256, 128>}]} {
    %c0 = arith.constant 0 : index
    %c0_0 = arith.constant 0 : index
    %0 = vector.load %arg1[%c0, %c0_0] : memref<256x128xf32, #tpu.memory_space<vmem>>, vector<256x128xf32>
    %c0_1 = arith.constant 0 : index
    %c0_2 = arith.constant 0 : index
    %1 = vector.load %arg2[%c0_1, %c0_2] : memref<128x128xf32, #tpu.memory_space<vmem>>, vector<128x128xf32>
    %cst = arith.constant dense<0.000000e+00> : vector<256x128xf32>
    %2 = tpu.matmul %0, %1, %cst {dimension_numbers = #tpu.dot_dimension_numbers<[1], [0], [0], [1], [0, 0, 1, 1], [], []>} : vector<256x128xf32>, vector<128x128xf32>, vector<256x128xf32> -> vector<256x128xf32>
    %c0_3 = arith.constant 0 : index
    %c0_4 = arith.constant 0 : index
    %3 = vector.load %arg3[%c0_3, %c0_4] : memref<1x128xf32, #tpu.memory_space<vmem>>, vector<1x128xf32>
    %4 = vector.broadcast %3 : vector<1x128xf32> to vector<256x128xf32>
    %5 = arith.addf %2, %4 : vector<256x128xf32>
    %cst_5 = arith.constant 0.000000e+00 : f32
    %6 = vector.broadcast %cst_5 : f32 to vector<256x128xf32>
    %7 = arith.maximumf %5, %6 : vector<256x128xf32>
    %c0_6 = arith.constant 0 : index
    %c0_7 = arith.constant 0 : index
    %c0_8 = arith.constant 0 : index
    %8 = vector.load %arg4[%c0_6, %c0_7, %c0_8] : memref<3x128x128xf32, #tpu.memory_space<vmem>>, vector<1x128x128xf32>
    %9 = vector.shape_cast %8 : vector<1x128x128xf32> to vector<128x128xf32>
    %cst_9 = arith.constant dense<0.000000e+00> : vector<256x128xf32>
    %10 = tpu.matmul %7, %9, %cst_9 {dimension_numbers = #tpu.dot_dimension_numbers<[1], [0], [0], [1], [0, 0, 1, 1], [], []>} : vector<256x128xf32>, vector<128x128xf32>, vector<256x128xf32> -> vector<256x128xf32>
    %c0_10 = arith.constant 0 : index
    %c0_11 = arith.constant 0 : index
    %11 = vector.load %arg5[%c0_10, %c0_11] : memref<3x128xf32, #tpu.memory_space<vmem>>, vector<1x128xf32>
    %12 = vector.broadcast %11 : vector<1x128xf32> to vector<256x128xf32>
    %13 = arith.addf %10, %12 : vector<256x128xf32>
    %14 = math.tanh %13 : vector<256x128xf32>
    %c1 = arith.constant 1 : index
    %c0_12 = arith.constant 0 : index
    %c0_13 = arith.constant 0 : index
    %15 = vector.load %arg4[%c1, %c0_12, %c0_13] : memref<3x128x128xf32, #tpu.memory_space<vmem>>, vector<1x128x128xf32>
    %16 = vector.shape_cast %15 : vector<1x128x128xf32> to vector<128x128xf32>
    %cst_14 = arith.constant dense<0.000000e+00> : vector<256x128xf32>
    %17 = tpu.matmul %14, %16, %cst_14 {dimension_numbers = #tpu.dot_dimension_numbers<[1], [0], [0], [1], [0, 0, 1, 1], [], []>} : vector<256x128xf32>, vector<128x128xf32>, vector<256x128xf32> -> vector<256x128xf32>
    %c1_15 = arith.constant 1 : index
    %c0_16 = arith.constant 0 : index
    %18 = vector.load %arg5[%c1_15, %c0_16] : memref<3x128xf32, #tpu.memory_space<vmem>>, vector<1x128xf32>
    %19 = vector.broadcast %18 : vector<1x128xf32> to vector<256x128xf32>
    %20 = arith.addf %17, %19 : vector<256x128xf32>
    %21 = math.tanh %20 : vector<256x128xf32>
    %c2 = arith.constant 2 : index
    %c0_17 = arith.constant 0 : index
    %c0_18 = arith.constant 0 : index
    %22 = vector.load %arg4[%c2, %c0_17, %c0_18] : memref<3x128x128xf32, #tpu.memory_space<vmem>>, vector<1x128x128xf32>
    %23 = vector.shape_cast %22 : vector<1x128x128xf32> to vector<128x128xf32>
    %cst_19 = arith.constant dense<0.000000e+00> : vector<256x128xf32>
    %24 = tpu.matmul %21, %23, %cst_19 {dimension_numbers = #tpu.dot_dimension_numbers<[1], [0], [0], [1], [0, 0, 1, 1], [], []>} : vector<256x128xf32>, vector<128x128xf32>, vector<256x128xf32> -> vector<256x128xf32>
    %c2_20 = arith.constant 2 : index
    %c0_21 = arith.constant 0 : index
    %25 = vector.load %arg5[%c2_20, %c0_21] : memref<3x128xf32, #tpu.memory_space<vmem>>, vector<1x128xf32>
    %26 = vector.broadcast %25 : vector<1x128xf32> to vector<256x128xf32>
    %27 = arith.addf %24, %26 : vector<256x128xf32>
    %28 = math.tanh %27 : vector<256x128xf32>
    %c0_22 = arith.constant 0 : index
    %c0_23 = arith.constant 0 : index
    %29 = vector.load %arg6[%c0_22, %c0_23] : memref<128x128xf32, #tpu.memory_space<vmem>>, vector<128x128xf32>
    %cst_24 = arith.constant dense<0.000000e+00> : vector<256x128xf32>
    %30 = tpu.matmul %28, %29, %cst_24 {dimension_numbers = #tpu.dot_dimension_numbers<[1], [0], [0], [1], [0, 0, 1, 1], [], []>} : vector<256x128xf32>, vector<128x128xf32>, vector<256x128xf32> -> vector<256x128xf32>
    %c0_25 = arith.constant 0 : index
    %c0_26 = arith.constant 0 : index
    %31 = vector.load %arg7[%c0_25, %c0_26] : memref<1x128xf32, #tpu.memory_space<vmem>>, vector<1x128xf32>
    %32 = vector.broadcast %31 : vector<1x128xf32> to vector<256x128xf32>
    %33 = arith.addf %30, %32 : vector<256x128xf32>
    %34 = arith.addf %33, %0 : vector<256x128xf32>
    %cst_27 = arith.constant 0.000000e+00 : f32
    %cst_28 = arith.constant 1.000000e+00 : f32
    %35 = vector.broadcast %cst_27 : f32 to vector<256x128xf32>
    %36 = arith.maximumf %35, %34 : vector<256x128xf32>
    %37 = vector.broadcast %cst_28 : f32 to vector<256x128xf32>
    %38 = arith.minimumf %37, %36 : vector<256x128xf32>
    %c0_29 = arith.constant 0 : index
    %c0_30 = arith.constant 0 : index
    %39 = vector.load %arg8[%c0_29, %c0_30] : memref<256x128xf32, #tpu.memory_space<vmem>>, vector<256x128xf32>
    tpu.vector_store %arg8[%c0_29, %c0_30], %38 {strides = array<i32>} : memref<256x128xf32, #tpu.memory_space<vmem>>, vector<256x128xf32>,
    return
  }
  func.func @transform_0(%arg0: i32) -> (i32, i32) {
    %c0_i32 = arith.constant 0 : i32
    %c0_i32_0 = arith.constant 0 : i32
    return %arg0, %c0_i32 : i32, i32
  }
  func.func @transform_1(%arg0: i32) -> (i32, i32) {
    %c0_i32 = arith.constant 0 : i32
    %c0_i32_0 = arith.constant 0 : i32
    %c0_i32_1 = arith.constant 0 : i32
    return %c0_i32, %c0_i32_0 : i32, i32
  }
  func.func @transform_2(%arg0: i32) -> (i32, i32) {
    %c0_i32 = arith.constant 0 : i32
    %c0_i32_0 = arith.constant 0 : i32
    %c0_i32_1 = arith.constant 0 : i32
    return %c0_i32, %c0_i32_0 : i32, i32
  }
  func.func @transform_3(%arg0: i32) -> (i32, i32, i32) {
    %c0_i32 = arith.constant 0 : i32
    %c0_i32_0 = arith.constant 0 : i32
    %c0_i32_1 = arith.constant 0 : i32
    %c0_i32_2 = arith.constant 0 : i32
    return %c0_i32, %c0_i32_0, %c0_i32_1 : i32, i32, i32
  }
  func.func @transform_4(%arg0: i32) -> (i32, i32) {
    %c0_i32 = arith.constant 0 : i32
    %c0_i32_0 = arith.constant 0 : i32
    %c0_i32_1 = arith.constant 0 : i32
    return %c0_i32, %c0_i32_0 : i32, i32
  }
  func.func @transform_5(%arg0: i32) -> (i32, i32) {
    %c0_i32 = arith.constant 0 : i32
    %c0_i32_0 = arith.constant 0 : i32
    %c0_i32_1 = arith.constant 0 : i32
    return %c0_i32, %c0_i32_0 : i32, i32
  }
  func.func @transform_6(%arg0: i32) -> (i32, i32) {
    %c0_i32 = arith.constant 0 : i32
    %c0_i32_0 = arith.constant 0 : i32
    %c0_i32_1 = arith.constant 0 : i32
    return %c0_i32, %c0_i32_0 : i32, i32
  }
  func.func @transform_7(%arg0: i32) -> (i32, i32) {
    %c0_i32 = arith.constant 0 : i32
    %c0_i32_0 = arith.constant 0 : i32
    return %arg0, %c0_i32 : i32, i32
  }
}

</mosaic_0001>

<bundles_post_ra>
// kernel: mapping_forward.1
= control target key start
LH: loop header
LB: loop body
LE: loop exit
PB: predicated region body
PF: predicated region fallthrough
CT: control target
= control target key end

     0   :  { %s3006_s24 = smov 0   ;;  %s3576_s0 = inlined_call_operand.vmem [shape: f32[512,128], index: 0, kind: input, shape index: {}]   ;;  %s3577_s1 = inlined_call_operand.vmem [shape: f32[128,128], index: 1, kind: input, shape index: {}]   ;;  %s3578_s2 = inlined_call_operand.vmem [shape: f32[1,128], index: 2, kind: input, shape index: {}]   ;;  %s3579_s3 = inlined_call_operand.vmem [shape: f32[3,128,128], index: 3, kind: input, shape index: {}]   ;;  %s3580_s4 = inlined_call_operand.vmem [shape: f32[3,128], index: 4, kind: input, shape index: {}]   ;;  %s3581_s5 = inlined_call_operand.vmem [shape: f32[128,128], index: 5, kind: input, shape index: {}]   ;;  %s3582_s6 = inlined_call_operand.vmem [shape: f32[1,128], index: 6, kind: input, shape index: {}]   ;;  %s3583_s7 = inlined_call_operand.vmem [shape: f32[512,128], index: 7, kind: output, shape index: {}]  }
   0x1 LB: > { %s1862_s25 = sadd.s32 4294967295, %s2964_s24   ;;  %p1866_p0 = scmp.ge.s32.totalorder %s2964_s24, 1  ;;  %s2964_s24 = sphi %s3006_s24, %s17_s24  }
   0x2   : > { %p238_p1 = scmp.lt.s32.totalorder %s2964_s24, 3 }
   0x4   : > { %p239_p2 = pnand %p1866_p0, %p238_p1 }
   0x5   : > { %v314_v0 = vld [vmem:[%s3577_s1] sm:$0xff] (!%p239_p2)  ;;  %v315_v1 = vld [vmem:[%s3577_s1 + $0x8] sm:$0xff] (!%p239_p2)  ;;  %v316_v2 = vld [vmem:[%s3577_s1 + $0x10] sm:$0xff] (!%p239_p2)  ;;  %s1867_s9 = sshll.u32 (!%p239_p2), %s1862_s25, 5 }
   0x6   : > { %242 = sbr.rel (%p239_p2) target bundleno = 1221 (0x4c5), region = 48  ;;  %v2550_v3 = vpack.c.bf16 (!%p239_p2), %v315_v1, %v314_v0  ;;  %v317_v4 = vld [vmem:[%s3577_s1 + $0x18] sm:$0xff] (!%p239_p2)  ;;  %p271_p3 = scmp.lt.s32.totalorder (!%p239_p2), %s1867_s9, 63  ;;  %v318_v6 = vld [vmem:[%s3577_s1 + $0x20] sm:$0xff] (!%p239_p2)  ;;  %v319_v7 = vld [vmem:[%s3577_s1 + $0x28] sm:$0xff] (!%p239_p2) }
   0x7   : > { %v2554_v5 = vpack.c.bf16 (!%p239_p2), %v317_v4, %v316_v2  ;;  %v2558_v8 = vpack.c.bf16 (!%p239_p2), %v319_v7, %v318_v6  ;;  %v320_v9 = vld [vmem:[%s3577_s1 + $0x30] sm:$0xff] (!%p239_p2)  ;;  %v321_v10 = vld [vmem:[%s3577_s1 + $0x38] sm:$0xff] (!%p239_p2)  ;;  %v322_v13 = vld [vmem:[%s3577_s1 + $0x40] sm:$0xff] (!%p239_p2) }
   0x8   : > { %2551 = vmatprep.subr.bf16.mxu0 (!%p239_p2), %v2550_v3  ;;  %2710 = vmatprep.subr.bf16.mxu1 (!%p239_p2), %v2550_v3  ;;  %v2562_v12 = vpack.c.bf16 (!%p239_p2), %v321_v10, %v320_v9  ;;  %v323_v14 = vld [vmem:[%s3577_s1 + $0x48] sm:$0xff] (!%p239_p2)  ;;  %v324_v17 = vld [vmem:[%s3577_s1 + $0x50] sm:$0xff] (!%p239_p2)  ;;  %v325_v18 = vld [vmem:[%s3577_s1 + $0x58] sm:$0xff] (!%p239_p2) }
   0x9   : > { %2553 = vmatpush3.bf16.msra.mxu0 (!%p239_p2), %v2550_v3  ;;  %2718 = vmatpush3.bf16.msra.mxu1 (!%p239_p2), %v2550_v3  ;;  %v2566_v16 = vpack.c.bf16 (!%p239_p2), %v323_v14, %v322_v13  ;;  %v2570_v19 = vpack.c.bf16 (!%p239_p2), %v325_v18, %v324_v17  ;;  %v326_v20 = vld [vmem:[%s3577_s1 + $0x60] sm:$0xff] (!%p239_p2)  ;;  %v327_v21 = vld [vmem:[%s3577_s1 + $0x68] sm:$0xff] (!%p239_p2)  ;;  %v328_v23 = vld [vmem:[%s3577_s1 + $0x70] sm:$0xff] (!%p239_p2) }
   0xa   : > { %2555 = vmatprep.subr.bf16.mxu0 (!%p239_p2), %v2554_v5  ;;  %2711 = vmatprep.subr.bf16.mxu1 (!%p239_p2), %v2554_v5  ;;  %v2574_v22 = vpack.c.bf16 (!%p239_p2), %v327_v21, %v326_v20  ;;  %v329_v24 = vld [vmem:[%s3577_s1 + $0x78] sm:$0xff] (!%p239_p2)  ;;  %v594_v26 = vld [vmem:[%s3579_s3] sm:$0xff] (!%p239_p2)  ;;  %v595_v27 = vld [vmem:[%s3579_s3 + $0x8] sm:$0xff] (!%p239_p2) }
   0xb   : > { %v2578_v25 = vpack.c.bf16 (!%p239_p2), %v329_v24, %v328_v23  ;;  %v2582_v28 = vpack.c.bf16 (!%p239_p2), %v595_v27, %v594_v26  ;;  %v596_v29 = vld [vmem:[%s3579_s3 + $0x10] sm:$0xff] (!%p239_p2)  ;;  %v597_v30 = vld [vmem:[%s3579_s3 + $0x18] sm:$0xff] (!%p239_p2)  ;;  %v598_v36 = vld [vmem:[%s3579_s3 + $0x20] sm:$0xff] (!%p239_p2) }
   0xc   : > { %v2586_v35 = vpack.c.bf16 (!%p239_p2), %v597_v30, %v596_v29  ;;  %v599_v37 = vld [vmem:[%s3579_s3 + $0x28] sm:$0xff] (!%p239_p2)  ;;  %v600_v43 = vld [vmem:[%s3579_s3 + $0x30] sm:$0xff] (!%p239_p2)  ;;  %v601_v44 = vld [vmem:[%s3579_s3 + $0x38] sm:$0xff] (!%p239_p2) }
   0xd   : > { %s3585_s9 = smov (!%p271_p3, %s1867_s9), 63  ;;  %2557 = vmatpush3.bf16.msra.mxu0 %v2554_v5  ;;  %2719 = vmatpush3.bf16.msra.mxu1 %v2554_v5  ;;  %v2590_v42 = vpack.c.bf16 %v599_v37, %v598_v36  ;;  %v2594_v49 = vpack.c.bf16 %v601_v44, %v600_v43  ;;  %v602_v50 = vld [vmem:[%s3579_s3 + $0x40] sm:$0xff]  ;;  %v603_v51 = vld [vmem:[%s3579_s3 + $0x48] sm:$0xff]  ;;  %v604_v57 = vld [vmem:[%s3579_s3 + $0x50] sm:$0xff] }
   0xe   : > { %s1868_s16 = sshll.u32 %s3585_s9, 3  ;;  %2559 = vmatprep.subr.bf16.mxu0 %v2558_v8  ;;  %2712 = vmatprep.subr.bf16.mxu1 %v2558_v8  ;;  %v2598_v56 = vpack.c.bf16 %v603_v51, %v602_v50  ;;  %v605_v58 = vld [vmem:[%s3579_s3 + $0x58] sm:$0xff]  ;;  %v606_v0 = vld [vmem:[%s3579_s3 + $0x60] sm:$0xff]  ;;  %v607_v1 = vld [vmem:[%s3579_s3 + $0x68] sm:$0xff] }
   0xf   : > { %s3046_s23 = scalar_lea.vmem %s3576_s0, %s1868_s16  ;;  %v2602_v63 = vpack.c.bf16 %v605_v58, %v604_v57  ;;  %v2606_v6 = vpack.c.bf16 %v607_v1, %v606_v0  ;;  %v608_v13 = vld [vmem:[%s3579_s3 + $0x70] sm:$0xff]  ;;  %v609_v14 = vld [vmem:[%s3579_s3 + $0x78] sm:$0xff]  ;;  %v1874_v17 = vld [vmem:[%s3579_s3 + $0x88] sm:$0xff]  ;;  %s3480_s29 = scalar_lea.vmem %s3583_s7, %s1868_s16 }
  0x10   : > { %v282_v11 = vld [vmem:[%s3046_s23] sm:$0xff]  ;;  %v283_v31 = vld [vmem:[%s3046_s23 + $0x8] sm:$0xff]  ;;  %v284_v32 = vld [vmem:[%s3046_s23 + $0x10] sm:$0xff] }
  0x11   : > { %2182 = vmatprep.mubr.f32.mxu0 %v282_v11  ;;  %2561 = vmatpush3.bf16.msra.mxu0 %v2558_v8  ;;  %v298_v15 = vld [vmem:[%s3046_s23 + $0x80] sm:$0xff]  ;;  %v299_v33 = vld [vmem:[%s3046_s23 + $0x88] sm:$0xff]  ;;  %v300_v34 = vld [vmem:[%s3046_s23 + $0x90] sm:$0xff] }
  0x12   : > { %2563 = vmatprep.subr.bf16.mxu0 %v2562_v12  ;;  %2720 = vmatpush3.bf16.msra.mxu1 %v2558_v8  ;;  %v285_v38 = vld [vmem:[%s3046_s23 + $0x18] sm:$0xff]  ;;  %v286_v39 = vld [vmem:[%s3046_s23 + $0x20] sm:$0xff]  ;;  %v287_v45 = vld [vmem:[%s3046_s23 + $0x28] sm:$0xff] }
  0x13   : > { %2713 = vmatprep.subr.bf16.mxu1 %v2562_v12  ;;  %2206 = vmatprep.mubr.f32.mxu1 %v298_v15  ;;  %v301_v40 = vld [vmem:[%s3046_s23 + $0x98] sm:$0xff]  ;;  %v302_v41 = vld [vmem:[%s3046_s23 + $0xa0] sm:$0xff]  ;;  %v288_v46 = vld [vmem:[%s3046_s23 + $0x30] sm:$0xff]  ;;  %v2610_v15 = vpack.c.bf16 %v609_v14, %v608_v13 }
  0x14   : > { %v303_v47 = vld [vmem:[%s3046_s23 + $0xa8] sm:$0xff]  ;;  %v304_v48 = vld [vmem:[%s3046_s23 + $0xb0] sm:$0xff]  ;;  %v289_v52 = vld [vmem:[%s3046_s23 + $0x38] sm:$0xff] }
  0x15   : > { %2565 = vmatpush3.bf16.msra.mxu0 %v2562_v12  ;;  %v290_v53 = vld [vmem:[%s3046_s23 + $0x40] sm:$0xff]  ;;  %v305_v54 = vld [vmem:[%s3046_s23 + $0xb8] sm:$0xff]  ;;  %v291_v59 = vld [vmem:[%s3046_s23 + $0x48] sm:$0xff] }
  0x16   : > { %2567 = vmatprep.subr.bf16.mxu0 %v2566_v16  ;;  %2721 = vmatpush3.bf16.msra.mxu1 %v2562_v12  ;;  %v306_v55 = vld [vmem:[%s3046_s23 + $0xc0] sm:$0xff]  ;;  %v292_v60 = vld [vmem:[%s3046_s23 + $0x50] sm:$0xff]  ;;  %v307_v61 = vld [vmem:[%s3046_s23 + $0xc8] sm:$0xff] }
  0x17   : > { %2714 = vmatprep.subr.bf16.mxu1 %v2566_v16  ;;  %v308_v62 = vld [vmem:[%s3046_s23 + $0xd0] sm:$0xff]  ;;  %v293_v2 = vld [vmem:[%s3046_s23 + $0x58] sm:$0xff]  ;;  %v294_v3 = vld [vmem:[%s3046_s23 + $0x60] sm:$0xff] }
  0x18   : > { %v309_v4 = vld [vmem:[%s3046_s23 + $0xd8] sm:$0xff]  ;;  %v310_v5 = vld [vmem:[%s3046_s23 + $0xe0] sm:$0xff]  ;;  %v295_v7 = vld [vmem:[%s3046_s23 + $0x68] sm:$0xff] }
  0x19   : > { %2569 = vmatpush3.bf16.msra.mxu0 %v2566_v16  ;;  %v296_v8 = vld [vmem:[%s3046_s23 + $0x70] sm:$0xff]  ;;  %v311_v9 = vld [vmem:[%s3046_s23 + $0xe8] sm:$0xff]  ;;  %v297_v11 = vld [vmem:[%s3046_s23 + $0x78] sm:$0xff] }
  0x1a   : > { %2571 = vmatprep.subr.bf16.mxu0 %v2570_v19  ;;  %2722 = vmatpush3.bf16.msra.mxu1 %v2566_v16  ;;  %v312_v10 = vld [vmem:[%s3046_s23 + $0xf0] sm:$0xff]  ;;  %v313_v12 = vld [vmem:[%s3046_s23 + $0xf8] sm:$0xff]  ;;  %v1873_v16 = vld [vmem:[%s3579_s3 + $0x80] sm:$0xff] }
  0x1b   : > { %2715 = vmatprep.subr.bf16.mxu1 %v2570_v19  ;;  %v1875_v18 = vld [vmem:[%s3579_s3 + $0x90] sm:$0xff]  ;;  %v1876_v20 = vld [vmem:[%s3579_s3 + $0x98] sm:$0xff]  ;;  %v1878_v23 = vld [vmem:[%s3579_s3 + $0xa8] sm:$0xff] }
  0x1c   : > { %v2618_v21 = vpack.c.bf16 %v1876_v20, %v1875_v18  ;;  %v1880_v26 = vld [vmem:[%s3579_s3 + $0xb8] sm:$0xff]  ;;  %v1882_v29 = vld [vmem:[%s3579_s3 + $0xc8] sm:$0xff] }
  0x1d   : > { %2573 = vmatpush3.bf16.msra.mxu0 %v2570_v19 }
  0x1e   : > { %2575 = vmatprep.subr.bf16.mxu0 %v2574_v22  ;;  %2723 = vmatpush3.bf16.msra.mxu1 %v2570_v19  ;;  %v2614_v19 = vpack.c.bf16 %v1874_v17, %v1873_v16 }
  0x1f   : > { %2716 = vmatprep.subr.bf16.mxu1 %v2574_v22 }
  0x21   : > { %2577 = vmatpush3.bf16.msra.mxu0 %v2574_v22 }
  0x22   : > { %2579 = vmatprep.subr.bf16.mxu0 %v2578_v25  ;;  %2724 = vmatpush3.bf16.msra.mxu1 %v2574_v22  ;;  %v1877_v22 = vld [vmem:[%s3579_s3 + $0xa0] sm:$0xff] }
  0x23   : > { %2717 = vmatprep.subr.bf16.mxu1 %v2578_v25  ;;  %v2622_v24 = vpack.c.bf16 %v1878_v23, %v1877_v22 }
  0x25   : > { %2581 = vmatpush3.bf16.msra.mxu0 %v2578_v25 }
  0x26   : > { %2725 = vmatpush3.bf16.msra.mxu1 %v2578_v25  ;;  %2615 = vmatprep.subr.bf16.mxu0 %v2614_v19  ;;  %v1879_v25 = vld [vmem:[%s3579_s3 + $0xb0] sm:$0xff] }
  0x27   : > { %2583 = vmatprep.subr.bf16.mxu1 %v2582_v28  ;;  %v2626_v27 = vpack.c.bf16 %v1880_v26, %v1879_v25 }
  0x28   : > { %2183 = vmatmul.mubr.f32.vlgmr.msra.gmra.mrb[0].mxu0 %v283_v31  ;;  %v3185_v31 = vld [vmem:[%s3578_s2] ss:$0 sm:$0xff] }
  0x29   : > { %2185 = vmatprep.mubr.f32.mxu0 %v284_v32  ;;  %2207 = vmatmul.mubr.f32.vlgmr.msra.gmra.mrb[0].mxu1 %v299_v33 }
  0x2a   : > { %2209 = vmatprep.mubr.f32.mxu1 %v300_v34  ;;  %2585 = vmatpush3.bf16.msra.mxu1 %v2582_v28  ;;  %v1881_v28 = vld [vmem:[%s3579_s3 + $0xc0] sm:$0xff] }
  0x2b   : > { %2587 = vmatprep.subr.bf16.mxu1 %v2586_v35  ;;  %2617 = vmatpush3.bf16.msra.mxu0 %v2614_v19  ;;  %v2630_v30 = vpack.c.bf16 %v1882_v29, %v1881_v28 }
  0x2c   : > { %2186 = vmatmul.mubr.f32.gmra.mrb[2].mxu0 %v285_v38  ;;  %2619 = vmatprep.subr.bf16.mxu0 %v2618_v21 }
  0x2d   : > { %2188 = vmatprep.mubr.f32.mxu0 %v286_v39  ;;  %2210 = vmatmul.mubr.f32.gmra.mrb[2].mxu1 %v301_v40 }
  0x2e   : > { %2212 = vmatprep.mubr.f32.mxu1 %v302_v41  ;;  %2589 = vmatpush3.bf16.msra.mxu1 %v2586_v35 }
  0x2f   : > { %2591 = vmatprep.subr.bf16.mxu1 %v2590_v42  ;;  %2621 = vmatpush3.bf16.msra.mxu0 %v2618_v21 }
  0x30   : > { %2189 = vmatmul.mubr.f32.gmra.mrb[4].mxu0 %v287_v45  ;;  %2623 = vmatprep.subr.bf16.mxu0 %v2622_v24 }
  0x31   : > { %2191 = vmatprep.mubr.f32.mxu0 %v288_v46  ;;  %2213 = vmatmul.mubr.f32.gmra.mrb[4].mxu1 %v303_v47 }
  0x32   : > { %2215 = vmatprep.mubr.f32.mxu1 %v304_v48  ;;  %2593 = vmatpush3.bf16.msra.mxu1 %v2590_v42 }
  0x33   : > { %2595 = vmatprep.subr.bf16.mxu1 %v2594_v49  ;;  %2625 = vmatpush3.bf16.msra.mxu0 %v2622_v24 }
  0x34   : > { %2192 = vmatmul.mubr.f32.gmra.mrb[6].mxu0 %v289_v52  ;;  %2627 = vmatprep.subr.bf16.mxu0 %v2626_v27 }
  0x35   : > { %2194 = vmatprep.mubr.f32.mxu0 %v290_v53  ;;  %2216 = vmatmul.mubr.f32.gmra.mrb[6].mxu1 %v305_v54 }
  0x36   : > { %2218 = vmatprep.mubr.f32.mxu1 %v306_v55  ;;  %2597 = vmatpush3.bf16.msra.mxu1 %v2594_v49 }
  0x37   : > { %2599 = vmatprep.subr.bf16.mxu1 %v2598_v56  ;;  %2629 = vmatpush3.bf16.msra.mxu0 %v2626_v27 }
  0x38   : > { %2195 = vmatmul.mubr.f32.gmra.mrb[8].mxu0 %v291_v59  ;;  %2631 = vmatprep.subr.bf16.mxu0 %v2630_v30 }
  0x39   : > { %2197 = vmatprep.mubr.f32.mxu0 %v292_v60  ;;  %2219 = vmatmul.mubr.f32.gmra.mrb[8].mxu1 %v307_v61 }
  0x3a   : > { %2221 = vmatprep.mubr.f32.mxu1 %v308_v62  ;;  %2601 = vmatpush3.bf16.msra.mxu1 %v2598_v56 }
  0x3b   : > { %2603 = vmatprep.subr.bf16.mxu1 %v2602_v63  ;;  %2633 = vmatpush3.bf16.msra.mxu0 %v2630_v30 }
  0x3c   : > { %2198 = vmatmul.mubr.f32.gmra.mrb[10].mxu0 %v293_v2 }
  0x3d   : > { %2200 = vmatprep.mubr.f32.mxu0 %v294_v3  ;;  %2222 = vmatmul.mubr.f32.gmra.mrb[10].mxu1 %v309_v4 }
  0x3e   : > { %2224 = vmatprep.mubr.f32.mxu1 %v310_v5  ;;  %2605 = vmatpush3.bf16.msra.mxu1 %v2602_v63 }
  0x3f   : > { %2607 = vmatprep.subr.bf16.mxu1 %v2606_v6 }
  0x40   : > { %2201 = vmatmul.mubr.f32.gmra.mrb[12].mxu0 %v295_v7 }
  0x41   : > { %2203 = vmatprep.mubr.f32.mxu0 %v296_v8  ;;  %2225 = vmatmul.mubr.f32.gmra.mrb[12].mxu1 %v311_v9 }
  0x42   : > { %2227 = vmatprep.mubr.f32.mxu1 %v312_v10  ;;  %2609 = vmatpush3.bf16.msra.mxu1 %v2606_v6 }
  0x43   : > { %2611 = vmatprep.subr.bf16.mxu1 %v2610_v15 }
  0x44   : > { %2204 = vmatmul.mubr.f32.gmra.mrb[14].mxu0 %v297_v11 }
  0x45   : > { %2228 = vmatmul.mubr.f32.gmra.mrb[14].mxu1 %v313_v12 }
  0x46   : > { %2613 = vmatpush3.bf16.msra.mxu1 %v2610_v15 }
  0xfb   : > { %v2184_v32 = vpop.f32.mrb[0].mxu0 }
  0xfc   : > { %v409_v33 = vadd.f32 %v2184_v32, %v3185_v31  ;;  %v403_v34 = vpop.f32.mrb[1].mxu0  ;;  %v3188_v35 = vpop.f32.mrb[0].mxu1 }
  0xfd   : > { %v404_v36 = vadd.f32 %v3185_v31, %v403_v34  ;;  %v3191_v37 = vpop.f32.mrb[1].mxu1 }
  0xfe   : > { %v563_v40 = vmax.f32 %v409_v33, 0.0  ;;  %v484_v24 = vadd.f32 %v3185_v31, %v3191_v37 }
  0xff   : > { %v562_v38 = vmax.f32 %v404_v36, 0.0  ;;  %v2187_v39 = vpop.f32.mrb[2].mxu0 }
 0x100   : > { %v419_v41 = vadd.f32 %v2187_v39, %v3185_v31  ;;  %v413_v42 = vpop.f32.mrb[3].mxu0  ;;  %v3194_v43 = vpop.f32.mrb[2].mxu1  ;;  %v578_v33 = vmax.f32 %v484_v24, 0.0  ;;  %v1900_v24 = vld [vmem:[%s3579_s3 + $0x150] sm:$0xff] }
 0x101   : > { %v414_v44 = vadd.f32 %v3185_v31, %v413_v42  ;;  %2262 = vmatprep.mubr.f32.mxu1 %v562_v38  ;;  %v3197_v45 = vpop.f32.mrb[3].mxu1  ;;  %v489_v38 = vadd.f32 %v3188_v35, %v3185_v31 }
 0x102   : > { %2263 = vmatmul.mubr.f32.vlgmr.msra.gmra.mrb[16].mxu1 %v563_v40  ;;  %v565_v48 = vmax.f32 %v419_v41, 0.0  ;;  %v494_v34 = vadd.f32 %v3185_v31, %v3197_v45  ;;  %v499_v41 = vadd.f32 %v3194_v43, %v3185_v31 }
 0x103   : > { %v564_v46 = vmax.f32 %v414_v44, 0.0  ;;  %v2190_v47 = vpop.f32.mrb[4].mxu0  ;;  %v579_v40 = vmax.f32 %v489_v38, 0.0 }
 0x104   : > { %v429_v49 = vadd.f32 %v2190_v47, %v3185_v31  ;;  %v423_v50 = vpop.f32.mrb[5].mxu0  ;;  %v3200_v51 = vpop.f32.mrb[4].mxu1  ;;  %v580_v37 = vmax.f32 %v494_v34, 0.0  ;;  %v581_v45 = vmax.f32 %v499_v41, 0.0 }
 0x105   : > { %v424_v52 = vadd.f32 %v3185_v31, %v423_v50  ;;  %2265 = vmatprep.mubr.f32.mxu1 %v564_v46  ;;  %v503_v53 = vpop.f32.mrb[5].mxu1  ;;  %v509_v46 = vadd.f32 %v3200_v51, %v3185_v31 }
 0x106   : > { %2266 = vmatmul.mubr.f32.gmra.mrb[18].mxu1 %v565_v48  ;;  %v567_v56 = vmax.f32 %v429_v49, 0.0  ;;  %v504_v39 = vadd.f32 %v3185_v31, %v503_v53 }
 0x107   : > { %v566_v54 = vmax.f32 %v424_v52, 0.0  ;;  %v2193_v55 = vpop.f32.mrb[6].mxu0  ;;  %v583_v48 = vmax.f32 %v509_v46, 0.0 }
 0x108   : > { %v439_v57 = vadd.f32 %v2193_v55, %v3185_v31  ;;  %v433_v58 = vpop.f32.mrb[7].mxu0  ;;  %v3204_v59 = vpop.f32.mrb[6].mxu1  ;;  %v582_v42 = vmax.f32 %v504_v39, 0.0 }
 0x109   : > { %v434_v60 = vadd.f32 %v3185_v31, %v433_v58  ;;  %2268 = vmatprep.mubr.f32.mxu1 %v566_v54  ;;  %v513_v61 = vpop.f32.mrb[7].mxu1  ;;  %v519_v49 = vadd.f32 %v3204_v59, %v3185_v31 }
 0x10a   : > { %2269 = vmatmul.mubr.f32.gmra.mrb[20].mxu1 %v567_v56  ;;  %v569_v0 = vmax.f32 %v439_v57, 0.0  ;;  %v514_v44 = vadd.f32 %v3185_v31, %v513_v61 }
 0x10b   : > { %v568_v62 = vmax.f32 %v434_v60, 0.0  ;;  %v2196_v63 = vpop.f32.mrb[8].mxu0  ;;  %v585_v52 = vmax.f32 %v519_v49, 0.0 }
 0x10c   : > { %v449_v1 = vadd.f32 %v2196_v63, %v3185_v31  ;;  %v443_v2 = vpop.f32.mrb[9].mxu0  ;;  %v3208_v3 = vpop.f32.mrb[8].mxu1  ;;  %v584_v35 = vmax.f32 %v514_v44, 0.0 }
 0x10d   : > { %v444_v4 = vadd.f32 %v3185_v31, %v443_v2  ;;  %2271 = vmatprep.mubr.f32.mxu1 %v568_v62  ;;  %v523_v5 = vpop.f32.mrb[9].mxu1  ;;  %v529_v53 = vadd.f32 %v3208_v3, %v3185_v31  ;;  %v1884_v2 = vld [vmem:[%s3579_s3 + $0xd8] sm:$0xff] }
 0x10e   : > { %2272 = vmatmul.mubr.f32.gmra.mrb[22].mxu1 %v569_v0  ;;  %v571_v8 = vmax.f32 %v449_v1, 0.0  ;;  %v524_v47 = vadd.f32 %v3185_v31, %v523_v5  ;;  %v1883_v1 = vld [vmem:[%s3579_s3 + $0xd0] sm:$0xff] }
 0x10f   : > { %v570_v6 = vmax.f32 %v444_v4, 0.0  ;;  %v2199_v7 = vpop.f32.mrb[10].mxu0  ;;  %v587_v55 = vmax.f32 %v529_v53, 0.0  ;;  %v2634_v3 = vpack.c.bf16 %v1884_v2, %v1883_v1  ;;  %v1885_v4 = vld [vmem:[%s3579_s3 + $0xe0] sm:$0xff] }
 0x110   : > { %v459_v9 = vadd.f32 %v2199_v7, %v3185_v31  ;;  %v453_v10 = vpop.f32.mrb[11].mxu0  ;;  %v2223_v11 = vpop.f32.mrb[10].mxu1  ;;  %v586_v43 = vmax.f32 %v524_v47, 0.0  ;;  %v1888_v7 = vld [vmem:[%s3579_s3 + $0xf8] sm:$0xff] }
 0x111   : > { %v454_v12 = vadd.f32 %v3185_v31, %v453_v10  ;;  %2274 = vmatprep.mubr.f32.mxu1 %v570_v6  ;;  %v533_v13 = vpop.f32.mrb[11].mxu1  ;;  %v539_v56 = vadd.f32 %v2223_v11, %v3185_v31  ;;  %2635 = vmatprep.subr.bf16.mxu0 %v2634_v3  ;;  %v1887_v6 = vld [vmem:[%s3579_s3 + $0xf0] sm:$0xff]  ;;  %v1891_v10 = vld [vmem:[%s3579_s3 + $0x108] sm:$0xff] }
 0x112   : > { %2275 = vmatmul.mubr.f32.gmra.mrb[24].mxu1 %v571_v8  ;;  %v573_v16 = vmax.f32 %v459_v9, 0.0  ;;  %v534_v50 = vadd.f32 %v3185_v31, %v533_v13  ;;  %2637 = vmatpush3.bf16.msra.mxu0 %v2634_v3  ;;  %v2642_v8 = vpack.c.bf16 %v1888_v7, %v1887_v6  ;;  %v1890_v9 = vld [vmem:[%s3579_s3 + $0x100] sm:$0xff]  ;;  %v1892_v11 = vld [vmem:[%s3579_s3 + $0x110] sm:$0xff]  ;;  %v1893_v13 = vld [vmem:[%s3579_s3 + $0x118] sm:$0xff] }
 0x113   : > { %v572_v14 = vmax.f32 %v454_v12, 0.0  ;;  %v2202_v15 = vpop.f32.mrb[12].mxu0  ;;  %v589_v59 = vmax.f32 %v539_v56, 0.0  ;;  %v2646_v12 = vpack.c.bf16 %v1891_v10, %v1890_v9 }
 0x114   : > { %v469_v17 = vadd.f32 %v2202_v15, %v3185_v31  ;;  %v463_v18 = vpop.f32.mrb[13].mxu0  ;;  %v2226_v19 = vpop.f32.mrb[12].mxu1  ;;  %v588_v51 = vmax.f32 %v534_v50, 0.0  ;;  %v1894_v15 = vld [vmem:[%s3579_s3 + $0x120] sm:$0xff] }
 0x115   : > { %v464_v20 = vadd.f32 %v3185_v31, %v463_v18  ;;  %2277 = vmatprep.mubr.f32.mxu1 %v572_v14  ;;  %v543_v21 = vpop.f32.mrb[13].mxu1  ;;  %v549_v60 = vadd.f32 %v2226_v19, %v3185_v31  ;;  %v2650_v14 = vpack.c.bf16 %v1893_v13, %v1892_v11  ;;  %2647 = vmatprep.subr.bf16.mxu1 %v2646_v12  ;;  %v1896_v18 = vld [vmem:[%s3579_s3 + $0x130] sm:$0xff]  ;;  %v1897_v19 = vld [vmem:[%s3579_s3 + $0x138] sm:$0xff] }
 0x116   : > { %2278 = vmatmul.mubr.f32.gmra.mrb[26].mxu1 %v573_v16  ;;  %v575_v25 = vmax.f32 %v469_v17, 0.0  ;;  %v544_v54 = vadd.f32 %v3185_v31, %v543_v21  ;;  %v1895_v16 = vld [vmem:[%s3579_s3 + $0x128] sm:$0xff]  ;;  %v1898_v21 = vld [vmem:[%s3579_s3 + $0x140] sm:$0xff] }
 0x117   : > { %v574_v22 = vmax.f32 %v464_v20, 0.0  ;;  %v2205_v23 = vpop.f32.mrb[14].mxu0  ;;  %v591_v62 = vmax.f32 %v549_v60, 0.0  ;;  %2649 = vmatpush3.bf16.msra.mxu1 %v2646_v12  ;;  %v2654_v17 = vpack.c.bf16 %v1895_v16, %v1894_v15  ;;  %v2658_v20 = vpack.c.bf16 %v1897_v19, %v1896_v18 }
 0x118   : > { %v479_v26 = vadd.f32 %v2205_v23, %v3185_v31  ;;  %v473_v27 = vpop.f32.mrb[15].mxu0  ;;  %v2229_v28 = vpop.f32.mrb[14].mxu1  ;;  %v590_v57 = vmax.f32 %v544_v54, 0.0  ;;  %2651 = vmatprep.subr.bf16.mxu1 %v2650_v14 }
 0x119   : > { %v474_v29 = vadd.f32 %v3185_v31, %v473_v27  ;;  %2280 = vmatprep.mubr.f32.mxu1 %v574_v22  ;;  %v553_v30 = vpop.f32.mrb[15].mxu1  ;;  %v559_v63 = vadd.f32 %v2229_v28, %v3185_v31  ;;  %v1899_v22 = vld [vmem:[%s3579_s3 + $0x148] sm:$0xff]  ;;  %v1902_v27 = vld [vmem:[%s3579_s3 + $0x160] sm:$0xff] }
 0x11a   : > { %2281 = vmatmul.mubr.f32.gmra.mrb[28].mxu1 %v575_v25  ;;  %v577_v36 = vmax.f32 %v479_v26, 0.0  ;;  %v554_v58 = vadd.f32 %v3185_v31, %v553_v30  ;;  %v1886_v31 = vld [vmem:[%s3579_s3 + $0xe8] sm:$0xff]  ;;  %v2662_v23 = vpack.c.bf16 %v1899_v22, %v1898_v21  ;;  %v1901_v25 = vld [vmem:[%s3579_s3 + $0x158] sm:$0xff]  ;;  %v3303_v30 = vld [vmem:[%s3580_s4] ss:$0 sm:$0xff] }
 0x11b   : > { %v576_v32 = vmax.f32 %v474_v29, 0.0  ;;  %v593_v0 = vmax.f32 %v559_v63, 0.0  ;;  %v2638_v5 = vpack.c.bf16 %v1886_v31, %v1885_v4  ;;  %2653 = vmatpush3.bf16.msra.mxu1 %v2650_v14  ;;  %v2666_v26 = vpack.c.bf16 %v1901_v25, %v1900_v24  ;;  %v1903_v28 = vld [vmem:[%s3579_s3 + $0x168] sm:$0xff] }
 0x11c   : > { %v592_v61 = vmax.f32 %v554_v58, 0.0  ;;  %2655 = vmatprep.subr.bf16.mxu1 %v2654_v17  ;;  %v2670_v29 = vpack.c.bf16 %v1903_v28, %v1902_v27 }
 0x11d   : > { %2283 = vmatprep.mubr.f32.mxu1 %v576_v32  ;;  %2639 = vmatprep.subr.bf16.mxu0 %v2638_v5 }
 0x11e   : > { %2284 = vmatmul.mubr.f32.gmra.mrb[30].mxu1 %v577_v36  ;;  %2641 = vmatpush3.bf16.msra.mxu0 %v2638_v5 }
 0x11f   : > { %2286 = vmatprep.mubr.f32.mxu1 %v578_v33  ;;  %2643 = vmatprep.subr.bf16.mxu0 %v2642_v8 }
 0x120   : > { %2657 = vmatpush3.bf16.msra.mxu1 %v2654_v17 }
 0x121   : > { %2659 = vmatprep.subr.bf16.mxu1 %v2658_v20 }
 0x122   : > { %2287 = vmatmul.mubr.f32.gmra.mrb[32].mxu1 %v579_v40  ;;  %2645 = vmatpush3.bf16.msra.mxu0 %v2642_v8 }
 0x123   : > { %2289 = vmatprep.mubr.f32.mxu1 %v580_v37 }
 0x124   : > { %2661 = vmatpush3.bf16.msra.mxu1 %v2658_v20 }
 0x125   : > { %2663 = vmatprep.subr.bf16.mxu1 %v2662_v23 }
 0x126   : > { %2290 = vmatmul.mubr.f32.gmra.mrb[34].mxu1 %v581_v45 }
 0x127   : > { %2292 = vmatprep.mubr.f32.mxu1 %v582_v42 }
 0x128   : > { %2665 = vmatpush3.bf16.msra.mxu1 %v2662_v23 }
 0x129   : > { %2667 = vmatprep.subr.bf16.mxu1 %v2666_v26 }
 0x12a   : > { %2293 = vmatmul.mubr.f32.gmra.mrb[36].mxu1 %v583_v48 }
 0x12b   : > { %2295 = vmatprep.mubr.f32.mxu1 %v584_v35 }
 0x12c   : > { %2669 = vmatpush3.bf16.msra.mxu1 %v2666_v26 }
 0x12d   : > { %2671 = vmatprep.subr.bf16.mxu1 %v2670_v29 }
 0x12e   : > { %2296 = vmatmul.mubr.f32.gmra.mrb[38].mxu1 %v585_v52 }
 0x12f   : > { %2298 = vmatprep.mubr.f32.mxu1 %v586_v43 }
 0x130   : > { %2673 = vmatpush3.bf16.msra.mxu1 %v2670_v29 }
 0x132   : > { %2299 = vmatmul.mubr.f32.gmra.mrb[40].mxu1 %v587_v55 }
 0x133   : > { %2301 = vmatprep.mubr.f32.mxu1 %v588_v51 }
 0x136   : > { %2302 = vmatmul.mubr.f32.gmra.mrb[42].mxu1 %v589_v59 }
 0x137   : > { %2304 = vmatprep.mubr.f32.mxu1 %v590_v57 }
 0x13a   : > { %2305 = vmatmul.mubr.f32.gmra.mrb[44].mxu1 %v591_v62 }
 0x13b   : > { %2307 = vmatprep.mubr.f32.mxu1 %v592_v61 }
 0x13e   : > { %2308 = vmatmul.mubr.f32.gmra.mrb[46].mxu1 %v593_v0 }
 0x1d5   : > { %v2264_v32 = vpop.f32.mrb[16].mxu1 }
 0x1d6   : > { %v687_v33 = vadd.f32 %v2264_v32, %v3303_v30  ;;  %v681_v34 = vpop.f32.mrb[17].mxu1 }
 0x1d7   : > { %v682_v36 = vadd.f32 %v3303_v30, %v681_v34 }
 0x1d9   : > { %2734 = vtanh.f32 %v682_v36  ;;  %v2267_v38 = vpop.f32.mrb[18].mxu1 }
 0x1da   : > { %2736 = vtanh.f32 %v687_v33  ;;  %v697_v37 = vadd.f32 %v2267_v38, %v3303_v30  ;;  %v691_v39 = vpop.f32.mrb[19].mxu1 }
 0x1db   : > { %v692_v40 = vadd.f32 %v3303_v30, %v691_v39 }
 0x1dd   : > { %2738 = vtanh.f32 %v692_v40  ;;  %v2270_v41 = vpop.f32.mrb[20].mxu1 }
 0x1de   : > { %2740 = vtanh.f32 %v697_v37  ;;  %v707_v42 = vadd.f32 %v2270_v41, %v3303_v30  ;;  %v701_v44 = vpop.f32.mrb[21].mxu1 }
 0x1df   : > { %v702_v45 = vadd.f32 %v3303_v30, %v701_v44 }
 0x1e1   : > { %2742 = vtanh.f32 %v702_v45  ;;  %v2273_v46 = vpop.f32.mrb[22].mxu1 }
 0x1e2   : > { %2744 = vtanh.f32 %v707_v42  ;;  %v717_v35 = vadd.f32 %v2273_v46, %v3303_v30  ;;  %v711_v47 = vpop.f32.mrb[23].mxu1 }
 0x1e3   : > { %v2735_v48 = vpop.eup %2734  ;;  %v712_v49 = vadd.f32 %v3303_v30, %v711_v47 }
 0x1e4   : > { %v2737_v43 = vpop.eup %2736  ;;  %2342 = vmatprep.mubr.f32.mxu0 %v2735_v48 }
 0x1e5   : > { %2746 = vtanh.f32 %v712_v49  ;;  %v2276_v50 = vpop.f32.mrb[24].mxu1  ;;  %2343 = vmatmul.mubr.f32.vlgmr.msra.gmra.mrb[16].mxu0 %v2737_v43 }
 0x1e6   : > { %2748 = vtanh.f32 %v717_v35  ;;  %v727_v52 = vadd.f32 %v2276_v50, %v3303_v30  ;;  %v721_v53 = vpop.f32.mrb[25].mxu1 }
 0x1e7   : > { %v2739_v51 = vpop.eup %2738  ;;  %v722_v54 = vadd.f32 %v3303_v30, %v721_v53 }
 0x1e8   : > { %v2741_v55 = vpop.eup %2740  ;;  %2345 = vmatprep.mubr.f32.mxu0 %v2739_v51 }
 0x1e9   : > { %2750 = vtanh.f32 %v722_v54  ;;  %v2279_v56 = vpop.f32.mrb[26].mxu1  ;;  %2346 = vmatmul.mubr.f32.gmra.mrb[18].mxu0 %v2741_v55 }
 0x1ea   : > { %2752 = vtanh.f32 %v727_v52  ;;  %v737_v57 = vadd.f32 %v2279_v56, %v3303_v30  ;;  %v731_v58 = vpop.f32.mrb[27].mxu1 }
 0x1eb   : > { %v2743_v59 = vpop.eup %2742  ;;  %v732_v60 = vadd.f32 %v3303_v30, %v731_v58 }
 0x1ec   : > { %v2745_v61 = vpop.eup %2744  ;;  %2348 = vmatprep.mubr.f32.mxu0 %v2743_v59 }
 0x1ed   : > { %2754 = vtanh.f32 %v732_v60  ;;  %v2282_v62 = vpop.f32.mrb[28].mxu1  ;;  %2349 = vmatmul.mubr.f32.gmra.mrb[20].mxu0 %v2745_v61 }
 0x1ee   : > { %2756 = vtanh.f32 %v737_v57  ;;  %v747_v63 = vadd.f32 %v2282_v62, %v3303_v30  ;;  %v741_v0 = vpop.f32.mrb[29].mxu1 }
 0x1ef   : > { %v2747_v1 = vpop.eup %2746  ;;  %v742_v2 = vadd.f32 %v3303_v30, %v741_v0 }
 0x1f0   : > { %v2749_v3 = vpop.eup %2748  ;;  %2351 = vmatprep.mubr.f32.mxu0 %v2747_v1  ;;  %v1905_v1 = vld [vmem:[%s3579_s3 + $0x178] sm:$0xff] }
 0x1f1   : > { %2758 = vtanh.f32 %v742_v2  ;;  %v2285_v4 = vpop.f32.mrb[30].mxu1  ;;  %2352 = vmatmul.mubr.f32.gmra.mrb[22].mxu0 %v2749_v3  ;;  %v1430_v3 = vld [vmem:[%s3581_s5] sm:$0xff] }
 0x1f2   : > { %2760 = vtanh.f32 %v747_v63  ;;  %v757_v31 = vadd.f32 %v2285_v4, %v3303_v30  ;;  %v751_v5 = vpop.f32.mrb[31].mxu1  ;;  %v1431_v4 = vld [vmem:[%s3581_s5 + $0x8] sm:$0xff] }
 0x1f3   : > { %v2751_v6 = vpop.eup %2750  ;;  %v752_v7 = vadd.f32 %v3303_v30, %v751_v5  ;;  %v2678_v5 = vpack.c.bf16 %v1431_v4, %v1430_v3 }
 0x1f4   : > { %v2753_v8 = vpop.eup %2752  ;;  %2354 = vmatprep.mubr.f32.mxu0 %v2751_v6  ;;  %v1433_v6 = vld [vmem:[%s3581_s5 + $0x18] sm:$0xff] }
 0x1f5   : > { %2762 = vtanh.f32 %v752_v7  ;;  %v2288_v9 = vpop.f32.mrb[32].mxu1  ;;  %2355 = vmatmul.mubr.f32.gmra.mrb[24].mxu0 %v2753_v8  ;;  %v1434_v8 = vld [vmem:[%s3581_s5 + $0x20] sm:$0xff]  ;;  %2679 = vmatprep.subr.bf16.mxu0 %v2678_v5 }
 0x1f6   : > { %2764 = vtanh.f32 %v757_v31  ;;  %v767_v10 = vadd.f32 %v2288_v9, %v3303_v30  ;;  %v761_v11 = vpop.f32.mrb[33].mxu1  ;;  %v1432_v31 = vld [vmem:[%s3581_s5 + $0x10] sm:$0xff]  ;;  %v1435_v9 = vld [vmem:[%s3581_s5 + $0x28] sm:$0xff]  ;;  %2681 = vmatpush3.bf16.msra.mxu0 %v2678_v5 }
 0x1f7   : > { %v2755_v12 = vpop.eup %2754  ;;  %v762_v13 = vadd.f32 %v3303_v30, %v761_v11  ;;  %v2682_v7 = vpack.c.bf16 %v1433_v6, %v1432_v31  ;;  %v1436_v11 = vld [vmem:[%s3581_s5 + $0x30] sm:$0xff] }
 0x1f8   : > { %v2757_v14 = vpop.eup %2756  ;;  %2357 = vmatprep.mubr.f32.mxu0 %v2755_v12  ;;  %v1437_v12 = vld [vmem:[%s3581_s5 + $0x38] sm:$0xff] }
 0x1f9   : > { %2766 = vtanh.f32 %v762_v13  ;;  %v2291_v15 = vpop.f32.mrb[34].mxu1  ;;  %2358 = vmatmul.mubr.f32.gmra.mrb[26].mxu0 %v2757_v14  ;;  %2683 = vmatprep.subr.bf16.mxu0 %v2682_v7  ;;  %v2690_v13 = vpack.c.bf16 %v1437_v12, %v1436_v11  ;;  %v1438_v14 = vld [vmem:[%s3581_s5 + $0x40] sm:$0xff] }
 0x1fa   : > { %2768 = vtanh.f32 %v767_v10  ;;  %v777_v16 = vadd.f32 %v2291_v15, %v3303_v30  ;;  %v771_v17 = vpop.f32.mrb[35].mxu1  ;;  %v2686_v10 = vpack.c.bf16 %v1435_v9, %v1434_v8  ;;  %2685 = vmatpush3.bf16.msra.mxu0 %v2682_v7  ;;  %v1439_v15 = vld [vmem:[%s3581_s5 + $0x48] sm:$0xff] }
 0x1fb   : > { %v2759_v18 = vpop.eup %2758  ;;  %v772_v19 = vadd.f32 %v3303_v30, %v771_v17  ;;  %v1440_v17 = vld [vmem:[%s3581_s5 + $0x50] sm:$0xff] }
 0x1fc   : > { %v2761_v20 = vpop.eup %2760  ;;  %2360 = vmatprep.mubr.f32.mxu0 %v2759_v18  ;;  %2687 = vmatprep.subr.bf16.mxu0 %v2686_v10  ;;  %v1441_v18 = vld [vmem:[%s3581_s5 + $0x58] sm:$0xff] }
 0x1fd   : > { %2770 = vtanh.f32 %v772_v19  ;;  %v2294_v21 = vpop.f32.mrb[36].mxu1  ;;  %2361 = vmatmul.mubr.f32.gmra.mrb[28].mxu0 %v2761_v20  ;;  %v2698_v19 = vpack.c.bf16 %v1441_v18, %v1440_v17  ;;  %v1442_v20 = vld [vmem:[%s3581_s5 + $0x60] sm:$0xff] }
 0x1fe   : > { %2772 = vtanh.f32 %v777_v16  ;;  %v787_v22 = vadd.f32 %v2294_v21, %v3303_v30  ;;  %v781_v23 = vpop.f32.mrb[37].mxu1  ;;  %2689 = vmatpush3.bf16.msra.mxu0 %v2686_v10  ;;  %v2694_v16 = vpack.c.bf16 %v1439_v15, %v1438_v14  ;;  %v1443_v21 = vld [vmem:[%s3581_s5 + $0x68] sm:$0xff] }
 0x1ff   : > { %v2763_v24 = vpop.eup %2762  ;;  %v782_v25 = vadd.f32 %v3303_v30, %v781_v23  ;;  %2691 = vmatprep.subr.bf16.mxu0 %v2690_v13  ;;  %v3388_v23 = vld [vmem:[%s3580_s4 + $0x1] ss:$0 sm:$0xff] }
 0x200   : > { %v2765_v26 = vpop.eup %2764  ;;  %2363 = vmatprep.mubr.f32.mxu0 %v2763_v24 }
 0x201   : > { %2774 = vtanh.f32 %v782_v25  ;;  %v2297_v27 = vpop.f32.mrb[38].mxu1  ;;  %2364 = vmatmul.mubr.f32.gmra.mrb[30].mxu0 %v2765_v26 }
 0x202   : > { %2776 = vtanh.f32 %v787_v22  ;;  %v797_v28 = vadd.f32 %v2297_v27, %v3303_v30  ;;  %v791_v29 = vpop.f32.mrb[39].mxu1  ;;  %2693 = vmatpush3.bf16.msra.mxu0 %v2690_v13  ;;  %v2702_v22 = vpack.c.bf16 %v1443_v21, %v1442_v20 }
 0x203   : > { %v2767_v32 = vpop.eup %2766  ;;  %v792_v33 = vadd.f32 %v3303_v30, %v791_v29  ;;  %2695 = vmatprep.subr.bf16.mxu0 %v2694_v16 }
 0x204   : > { %v2769_v34 = vpop.eup %2768  ;;  %2366 = vmatprep.mubr.f32.mxu0 %v2767_v32 }
 0x205   : > { %2778 = vtanh.f32 %v792_v33  ;;  %v2300_v36 = vpop.f32.mrb[40].mxu1  ;;  %2367 = vmatmul.mubr.f32.gmra.mrb[32].mxu0 %v2769_v34 }
 0x206   : > { %2780 = vtanh.f32 %v797_v28  ;;  %v807_v38 = vadd.f32 %v2300_v36, %v3303_v30  ;;  %v801_v37 = vpop.f32.mrb[41].mxu1  ;;  %2697 = vmatpush3.bf16.msra.mxu0 %v2694_v16 }
 0x207   : > { %v2771_v39 = vpop.eup %2770  ;;  %v802_v40 = vadd.f32 %v3303_v30, %v801_v37  ;;  %2699 = vmatprep.subr.bf16.mxu0 %v2698_v19 }
 0x208   : > { %v2773_v41 = vpop.eup %2772  ;;  %2369 = vmatprep.mubr.f32.mxu0 %v2771_v39 }
 0x209   : > { %2782 = vtanh.f32 %v802_v40  ;;  %v2303_v42 = vpop.f32.mrb[42].mxu1  ;;  %2370 = vmatmul.mubr.f32.gmra.mrb[34].mxu0 %v2773_v41 }
 0x20a   : > { %2784 = vtanh.f32 %v807_v38  ;;  %v817_v44 = vadd.f32 %v2303_v42, %v3303_v30  ;;  %v811_v45 = vpop.f32.mrb[43].mxu1  ;;  %2701 = vmatpush3.bf16.msra.mxu0 %v2698_v19 }
 0x20b   : > { %v2775_v46 = vpop.eup %2774  ;;  %v812_v35 = vadd.f32 %v3303_v30, %v811_v45  ;;  %2703 = vmatprep.subr.bf16.mxu0 %v2702_v22 }
 0x20c   : > { %v2777_v47 = vpop.eup %2776  ;;  %2372 = vmatprep.mubr.f32.mxu0 %v2775_v46 }
 0x20d   : > { %2786 = vtanh.f32 %v812_v35  ;;  %v2306_v48 = vpop.f32.mrb[44].mxu1  ;;  %2373 = vmatmul.mubr.f32.gmra.mrb[36].mxu0 %v2777_v47 }
 0x20e   : > { %2788 = vtanh.f32 %v817_v44  ;;  %v827_v49 = vadd.f32 %v2306_v48, %v3303_v30  ;;  %v821_v43 = vpop.f32.mrb[45].mxu1  ;;  %2705 = vmatpush3.bf16.msra.mxu0 %v2702_v22 }
 0x20f   : > { %v2779_v50 = vpop.eup %2778  ;;  %v822_v52 = vadd.f32 %v3303_v30, %v821_v43 }
 0x210   : > { %v2781_v53 = vpop.eup %2780  ;;  %2375 = vmatprep.mubr.f32.mxu0 %v2779_v50 }
 0x211   : > { %2790 = vtanh.f32 %v822_v52  ;;  %v2309_v51 = vpop.f32.mrb[46].mxu1  ;;  %2376 = vmatmul.mubr.f32.gmra.mrb[38].mxu0 %v2781_v53 }
 0x212   : > { %2792 = vtanh.f32 %v827_v49  ;;  %v837_v54 = vadd.f32 %v2309_v51, %v3303_v30  ;;  %v831_v55 = vpop.f32.mrb[47].mxu1 }
 0x213   : > { %v2783_v56 = vpop.eup %2782  ;;  %v832_v57 = vadd.f32 %v3303_v30, %v831_v55  ;;  %v1904_v30 = vld [vmem:[%s3579_s3 + $0x170] sm:$0xff] }
 0x214   : > { %v2785_v58 = vpop.eup %2784  ;;  %2378 = vmatprep.mubr.f32.mxu0 %v2783_v56  ;;  %v2674_v2 = vpack.c.bf16 %v1905_v1, %v1904_v30 }
 0x215   : > { %2794 = vtanh.f32 %v832_v57  ;;  %2379 = vmatmul.mubr.f32.gmra.mrb[40].mxu0 %v2785_v58 }
 0x216   : > { %2796 = vtanh.f32 %v837_v54  ;;  %2675 = vmatprep.subr.bf16.mxu1 %v2674_v2 }
 0x217   : > { %v2787_v59 = vpop.eup %2786  ;;  %2677 = vmatpush3.bf16.msra.mxu1 %v2674_v2 }
 0x218   : > { %v2789_v60 = vpop.eup %2788  ;;  %2381 = vmatprep.mubr.f32.mxu0 %v2787_v59 }
 0x219   : > { %2382 = vmatmul.mubr.f32.gmra.mrb[42].mxu0 %v2789_v60 }
 0x21b   : > { %v2791_v61 = vpop.eup %2790 }
 0x21c   : > { %v2793_v62 = vpop.eup %2792  ;;  %2384 = vmatprep.mubr.f32.mxu0 %v2791_v61 }
 0x21d   : > { %2385 = vmatmul.mubr.f32.gmra.mrb[44].mxu0 %v2793_v62 }
 0x21f   : > { %v2795_v63 = vpop.eup %2794 }
 0x220   : > { %v2797_v0 = vpop.eup %2796  ;;  %2387 = vmatprep.mubr.f32.mxu0 %v2795_v63 }
 0x221   : > { %2388 = vmatmul.mubr.f32.gmra.mrb[46].mxu0 %v2797_v0 }
 0x2b8   : > { %v2344_v24 = vpop.f32.mrb[16].mxu0 }
 0x2b9   : > { %v966_v25 = vadd.f32 %v2344_v24, %v3388_v23  ;;  %v960_v26 = vpop.f32.mrb[17].mxu0 }
 0x2ba   : > { %v961_v27 = vadd.f32 %v3388_v23, %v960_v26 }
 0x2bc   : > { %2798 = vtanh.f32 %v961_v27  ;;  %v2347_v28 = vpop.f32.mrb[18].mxu0 }
 0x2bd   : > { %2800 = vtanh.f32 %v966_v25  ;;  %v976_v29 = vadd.f32 %v2347_v28, %v3388_v23  ;;  %v970_v32 = vpop.f32.mrb[19].mxu0 }
 0x2be   : > { %v971_v33 = vadd.f32 %v3388_v23, %v970_v32 }
 0x2c0   : > { %2802 = vtanh.f32 %v971_v33  ;;  %v2350_v34 = vpop.f32.mrb[20].mxu0 }
 0x2c1   : > { %2804 = vtanh.f32 %v976_v29  ;;  %v986_v36 = vadd.f32 %v2350_v34, %v3388_v23  ;;  %v980_v38 = vpop.f32.mrb[21].mxu0 }
 0x2c2   : > { %v981_v37 = vadd.f32 %v3388_v23, %v980_v38 }
 0x2c4   : > { %2806 = vtanh.f32 %v981_v37  ;;  %v2353_v39 = vpop.f32.mrb[22].mxu0 }
 0x2c5   : > { %2808 = vtanh.f32 %v986_v36  ;;  %v996_v40 = vadd.f32 %v2353_v39, %v3388_v23  ;;  %v990_v41 = vpop.f32.mrb[23].mxu0 }
 0x2c6   : > { %v2799_v42 = vpop.eup %2798  ;;  %v991_v44 = vadd.f32 %v3388_v23, %v990_v41 }
 0x2c7   : > { %v2801_v45 = vpop.eup %2800  ;;  %2422 = vmatprep.mubr.f32.mxu1 %v2799_v42 }
 0x2c8   : > { %2810 = vtanh.f32 %v991_v44  ;;  %v2356_v46 = vpop.f32.mrb[24].mxu0  ;;  %2423 = vmatmul.mubr.f32.vlgmr.msra.gmra.mrb[48].mxu1 %v2801_v45 }
 0x2c9   : > { %2812 = vtanh.f32 %v996_v40  ;;  %v1006_v35 = vadd.f32 %v2356_v46, %v3388_v23  ;;  %v1000_v47 = vpop.f32.mrb[25].mxu0 }
 0x2ca   : > { %v2803_v48 = vpop.eup %2802  ;;  %v1001_v49 = vadd.f32 %v3388_v23, %v1000_v47 }
 0x2cb   : > { %v2805_v43 = vpop.eup %2804  ;;  %2425 = vmatprep.mubr.f32.mxu1 %v2803_v48 }
 0x2cc   : > { %2814 = vtanh.f32 %v1001_v49  ;;  %v2359_v50 = vpop.f32.mrb[26].mxu0  ;;  %2426 = vmatmul.mubr.f32.gmra.mrb[50].mxu1 %v2805_v43 }
 0x2cd   : > { %2816 = vtanh.f32 %v1006_v35  ;;  %v1016_v52 = vadd.f32 %v2359_v50, %v3388_v23  ;;  %v1010_v53 = vpop.f32.mrb[27].mxu0 }
 0x2ce   : > { %v2807_v51 = vpop.eup %2806  ;;  %v1011_v54 = vadd.f32 %v3388_v23, %v1010_v53 }
 0x2cf   : > { %v2809_v55 = vpop.eup %2808  ;;  %2428 = vmatprep.mubr.f32.mxu1 %v2807_v51 }
 0x2d0   : > { %2818 = vtanh.f32 %v1011_v54  ;;  %v2362_v56 = vpop.f32.mrb[28].mxu0  ;;  %2429 = vmatmul.mubr.f32.gmra.mrb[52].mxu1 %v2809_v55 }
 0x2d1   : > { %2820 = vtanh.f32 %v1016_v52  ;;  %v1026_v57 = vadd.f32 %v2362_v56, %v3388_v23  ;;  %v1020_v58 = vpop.f32.mrb[29].mxu0 }
 0x2d2   : > { %v2811_v59 = vpop.eup %2810  ;;  %v1021_v60 = vadd.f32 %v3388_v23, %v1020_v58 }
 0x2d3   : > { %v2813_v61 = vpop.eup %2812  ;;  %2431 = vmatprep.mubr.f32.mxu1 %v2811_v59  ;;  %v1445_v59 = vld [vmem:[%s3581_s5 + $0x78] sm:$0xff] }
 0x2d4   : > { %2822 = vtanh.f32 %v1021_v60  ;;  %v2365_v62 = vpop.f32.mrb[30].mxu0  ;;  %2432 = vmatmul.mubr.f32.gmra.mrb[54].mxu1 %v2813_v61  ;;  %v3431_v61 = vld [vmem:[%s3580_s4 + $0x2] ss:$0 sm:$0xff] }
 0x2d5   : > { %2824 = vtanh.f32 %v1026_v57  ;;  %v1036_v63 = vadd.f32 %v2365_v62, %v3388_v23  ;;  %v1030_v0 = vpop.f32.mrb[31].mxu0 }
 0x2d6   : > { %v2815_v30 = vpop.eup %2814  ;;  %v1031_v1 = vadd.f32 %v3388_v23, %v1030_v0 }
 0x2d7   : > { %v2817_v2 = vpop.eup %2816  ;;  %2434 = vmatprep.mubr.f32.mxu1 %v2815_v30 }
 0x2d8   : > { %2826 = vtanh.f32 %v1031_v1  ;;  %v2368_v3 = vpop.f32.mrb[32].mxu0  ;;  %2435 = vmatmul.mubr.f32.gmra.mrb[56].mxu1 %v2817_v2 }
 0x2d9   : > { %2828 = vtanh.f32 %v1036_v63  ;;  %v1046_v4 = vadd.f32 %v2368_v3, %v3388_v23  ;;  %v1040_v31 = vpop.f32.mrb[33].mxu0 }
 0x2da   : > { %v2819_v5 = vpop.eup %2818  ;;  %v1041_v6 = vadd.f32 %v3388_v23, %v1040_v31 }
 0x2db   : > { %v2821_v7 = vpop.eup %2820  ;;  %2437 = vmatprep.mubr.f32.mxu1 %v2819_v5 }
 0x2dc   : > { %2830 = vtanh.f32 %v1041_v6  ;;  %v2371_v8 = vpop.f32.mrb[34].mxu0  ;;  %2438 = vmatmul.mubr.f32.gmra.mrb[58].mxu1 %v2821_v7 }
 0x2dd   : > { %2832 = vtanh.f32 %v1046_v4  ;;  %v1056_v9 = vadd.f32 %v2371_v8, %v3388_v23  ;;  %v1050_v10 = vpop.f32.mrb[35].mxu0 }
 0x2de   : > { %v2823_v11 = vpop.eup %2822  ;;  %v1051_v12 = vadd.f32 %v3388_v23, %v1050_v10 }
 0x2df   : > { %v2825_v13 = vpop.eup %2824  ;;  %2440 = vmatprep.mubr.f32.mxu1 %v2823_v11 }
 0x2e0   : > { %2834 = vtanh.f32 %v1051_v12  ;;  %v2374_v14 = vpop.f32.mrb[36].mxu0  ;;  %2441 = vmatmul.mubr.f32.gmra.mrb[60].mxu1 %v2825_v13 }
 0x2e1   : > { %2836 = vtanh.f32 %v1056_v9  ;;  %v1066_v15 = vadd.f32 %v2374_v14, %v3388_v23  ;;  %v1060_v16 = vpop.f32.mrb[37].mxu0 }
 0x2e2   : > { %v2827_v17 = vpop.eup %2826  ;;  %v1061_v18 = vadd.f32 %v3388_v23, %v1060_v16 }
 0x2e3   : > { %v2829_v19 = vpop.eup %2828  ;;  %2443 = vmatprep.mubr.f32.mxu1 %v2827_v17 }
 0x2e4   : > { %2838 = vtanh.f32 %v1061_v18  ;;  %v2377_v20 = vpop.f32.mrb[38].mxu0  ;;  %2444 = vmatmul.mubr.f32.gmra.mrb[62].mxu1 %v2829_v19 }
 0x2e5   : > { %2840 = vtanh.f32 %v1066_v15  ;;  %v1076_v21 = vadd.f32 %v2377_v20, %v3388_v23  ;;  %v1070_v22 = vpop.f32.mrb[39].mxu0 }
 0x2e6   : > { %v2831_v24 = vpop.eup %2830  ;;  %v1071_v25 = vadd.f32 %v3388_v23, %v1070_v22 }
 0x2e7   : > { %v2833_v26 = vpop.eup %2832  ;;  %2446 = vmatprep.mubr.f32.mxu1 %v2831_v24 }
 0x2e8   : > { %2842 = vtanh.f32 %v1071_v25  ;;  %v2380_v27 = vpop.f32.mrb[40].mxu0  ;;  %2447 = vmatmul.mubr.f32.gmra.mrb[64].mxu1 %v2833_v26 }
 0x2e9   : > { %2844 = vtanh.f32 %v1076_v21  ;;  %v1086_v28 = vadd.f32 %v2380_v27, %v3388_v23  ;;  %v1080_v29 = vpop.f32.mrb[41].mxu0 }
 0x2ea   : > { %v2835_v32 = vpop.eup %2834  ;;  %v1081_v33 = vadd.f32 %v3388_v23, %v1080_v29 }
 0x2eb   : > { %v2837_v34 = vpop.eup %2836  ;;  %2449 = vmatprep.mubr.f32.mxu1 %v2835_v32 }
 0x2ec   : > { %2846 = vtanh.f32 %v1081_v33  ;;  %v2383_v36 = vpop.f32.mrb[42].mxu0  ;;  %2450 = vmatmul.mubr.f32.gmra.mrb[66].mxu1 %v2837_v34 }
 0x2ed   : > { %2848 = vtanh.f32 %v1086_v28  ;;  %v1096_v38 = vadd.f32 %v2383_v36, %v3388_v23  ;;  %v1090_v37 = vpop.f32.mrb[43].mxu0 }
 0x2ee   : > { %v2839_v39 = vpop.eup %2838  ;;  %v1091_v40 = vadd.f32 %v3388_v23, %v1090_v37 }
 0x2ef   : > { %v2841_v41 = vpop.eup %2840  ;;  %2452 = vmatprep.mubr.f32.mxu1 %v2839_v39 }
 0x2f0   : > { %2850 = vtanh.f32 %v1091_v40  ;;  %v2386_v42 = vpop.f32.mrb[44].mxu0  ;;  %2453 = vmatmul.mubr.f32.gmra.mrb[68].mxu1 %v2841_v41 }
 0x2f1   : > { %2852 = vtanh.f32 %v1096_v38  ;;  %v1106_v44 = vadd.f32 %v2386_v42, %v3388_v23  ;;  %v1100_v45 = vpop.f32.mrb[45].mxu0 }
 0x2f2   : > { %v2843_v46 = vpop.eup %2842  ;;  %v1101_v35 = vadd.f32 %v3388_v23, %v1100_v45 }
 0x2f3   : > { %v2845_v47 = vpop.eup %2844  ;;  %2455 = vmatprep.mubr.f32.mxu1 %v2843_v46 }
 0x2f4   : > { %2854 = vtanh.f32 %v1101_v35  ;;  %v2389_v48 = vpop.f32.mrb[46].mxu0  ;;  %2456 = vmatmul.mubr.f32.gmra.mrb[70].mxu1 %v2845_v47 }
 0x2f5   : > { %2856 = vtanh.f32 %v1106_v44  ;;  %v1116_v49 = vadd.f32 %v2389_v48, %v3388_v23  ;;  %v1110_v43 = vpop.f32.mrb[47].mxu0 }
 0x2f6   : > { %v2847_v50 = vpop.eup %2846  ;;  %v1111_v52 = vadd.f32 %v3388_v23, %v1110_v43  ;;  %v1444_v23 = vld [vmem:[%s3581_s5 + $0x70] sm:$0xff] }
 0x2f7   : > { %v2849_v53 = vpop.eup %2848  ;;  %2458 = vmatprep.mubr.f32.mxu1 %v2847_v50  ;;  %v2706_v60 = vpack.c.bf16 %v1445_v59, %v1444_v23 }
 0x2f8   : > { %2858 = vtanh.f32 %v1111_v52  ;;  %2459 = vmatmul.mubr.f32.gmra.mrb[72].mxu1 %v2849_v53 }
 0x2f9   : > { %2860 = vtanh.f32 %v1116_v49  ;;  %2707 = vmatprep.subr.bf16.mxu0 %v2706_v60 }
 0x2fa   : > { %v2851_v51 = vpop.eup %2850  ;;  %2709 = vmatpush3.bf16.msra.mxu0 %v2706_v60 }
 0x2fb   : > { %v2853_v54 = vpop.eup %2852  ;;  %2461 = vmatprep.mubr.f32.mxu1 %v2851_v51 }
 0x2fc   : > { %2462 = vmatmul.mubr.f32.gmra.mrb[74].mxu1 %v2853_v54 }
 0x2fe   : > { %v2855_v55 = vpop.eup %2854 }
 0x2ff   : > { %v2857_v56 = vpop.eup %2856  ;;  %2464 = vmatprep.mubr.f32.mxu1 %v2855_v55 }
 0x300   : > { %2465 = vmatmul.mubr.f32.gmra.mrb[76].mxu1 %v2857_v56 }
 0x302   : > { %v2859_v57 = vpop.eup %2858 }
 0x303   : > { %v2861_v58 = vpop.eup %2860  ;;  %2467 = vmatprep.mubr.f32.mxu1 %v2859_v57 }
 0x304   : > { %2468 = vmatmul.mubr.f32.gmra.mrb[78].mxu1 %v2861_v58 }
 0x39b   : > { %v2424_v62 = vpop.f32.mrb[48].mxu1 }
 0x39c   : > { %v1245_v63 = vadd.f32 %v2424_v62, %v3431_v61  ;;  %v1239_v0 = vpop.f32.mrb[49].mxu1 }
 0x39d   : > { %v1240_v30 = vadd.f32 %v3431_v61, %v1239_v0 }
 0x39f   : > { %2862 = vtanh.f32 %v1240_v30  ;;  %v2427_v1 = vpop.f32.mrb[50].mxu1 }
 0x3a0   : > { %2864 = vtanh.f32 %v1245_v63  ;;  %v1255_v2 = vadd.f32 %v2427_v1, %v3431_v61  ;;  %v1249_v3 = vpop.f32.mrb[51].mxu1 }
 0x3a1   : > { %v1250_v4 = vadd.f32 %v3431_v61, %v1249_v3 }
 0x3a3   : > { %2866 = vtanh.f32 %v1250_v4  ;;  %v2430_v31 = vpop.f32.mrb[52].mxu1 }
 0x3a4   : > { %2868 = vtanh.f32 %v1255_v2  ;;  %v1265_v5 = vadd.f32 %v2430_v31, %v3431_v61  ;;  %v1259_v6 = vpop.f32.mrb[53].mxu1 }
 0x3a5   : > { %v1260_v7 = vadd.f32 %v3431_v61, %v1259_v6 }
 0x3a7   : > { %2870 = vtanh.f32 %v1260_v7  ;;  %v2433_v8 = vpop.f32.mrb[54].mxu1 }
 0x3a8   : > { %2872 = vtanh.f32 %v1265_v5  ;;  %v1275_v9 = vadd.f32 %v2433_v8, %v3431_v61  ;;  %v1269_v10 = vpop.f32.mrb[55].mxu1 }
 0x3a9   : > { %v2863_v11 = vpop.eup %2862  ;;  %v1270_v12 = vadd.f32 %v3431_v61, %v1269_v10 }
 0x3aa   : > { %v2865_v13 = vpop.eup %2864  ;;  %2502 = vmatprep.mubr.f32.mxu0 %v2863_v11 }
 0x3ab   : > { %2874 = vtanh.f32 %v1270_v12  ;;  %v2436_v14 = vpop.f32.mrb[56].mxu1  ;;  %2503 = vmatmul.mubr.f32.vlgmr.msra.gmra.mrb[48].mxu0 %v2865_v13 }
 0x3ac   : > { %2876 = vtanh.f32 %v1275_v9  ;;  %v1285_v15 = vadd.f32 %v2436_v14, %v3431_v61  ;;  %v1279_v16 = vpop.f32.mrb[57].mxu1 }
 0x3ad   : > { %v2867_v17 = vpop.eup %2866  ;;  %v1280_v18 = vadd.f32 %v3431_v61, %v1279_v16 }
 0x3ae   : > { %v2869_v19 = vpop.eup %2868  ;;  %2505 = vmatprep.mubr.f32.mxu0 %v2867_v17 }
 0x3af   : > { %2878 = vtanh.f32 %v1280_v18  ;;  %v2439_v20 = vpop.f32.mrb[58].mxu1  ;;  %2506 = vmatmul.mubr.f32.gmra.mrb[50].mxu0 %v2869_v19 }
 0x3b0   : > { %2880 = vtanh.f32 %v1285_v15  ;;  %v1295_v21 = vadd.f32 %v2439_v20, %v3431_v61  ;;  %v1289_v22 = vpop.f32.mrb[59].mxu1 }
 0x3b1   : > { %v2871_v24 = vpop.eup %2870  ;;  %v1290_v25 = vadd.f32 %v3431_v61, %v1289_v22 }
 0x3b2   : > { %v2873_v26 = vpop.eup %2872  ;;  %2508 = vmatprep.mubr.f32.mxu0 %v2871_v24 }
 0x3b3   : > { %2882 = vtanh.f32 %v1290_v25  ;;  %v2442_v27 = vpop.f32.mrb[60].mxu1  ;;  %2509 = vmatmul.mubr.f32.gmra.mrb[52].mxu0 %v2873_v26 }
 0x3b4   : > { %2884 = vtanh.f32 %v1295_v21  ;;  %v1305_v28 = vadd.f32 %v2442_v27, %v3431_v61  ;;  %v1299_v29 = vpop.f32.mrb[61].mxu1 }
 0x3b5   : > { %v2875_v32 = vpop.eup %2874  ;;  %v1300_v33 = vadd.f32 %v3431_v61, %v1299_v29 }
 0x3b6   : > { %v2877_v34 = vpop.eup %2876  ;;  %2511 = vmatprep.mubr.f32.mxu0 %v2875_v32 }
 0x3b7   : > { %2886 = vtanh.f32 %v1300_v33  ;;  %v2445_v36 = vpop.f32.mrb[62].mxu1  ;;  %2512 = vmatmul.mubr.f32.gmra.mrb[54].mxu0 %v2877_v34 }
 0x3b8   : > { %2888 = vtanh.f32 %v1305_v28  ;;  %v1315_v38 = vadd.f32 %v2445_v36, %v3431_v61  ;;  %v1309_v37 = vpop.f32.mrb[63].mxu1 }
 0x3b9   : > { %v2879_v39 = vpop.eup %2878  ;;  %v1310_v40 = vadd.f32 %v3431_v61, %v1309_v37 }
 0x3ba   : > { %v2881_v41 = vpop.eup %2880  ;;  %2514 = vmatprep.mubr.f32.mxu0 %v2879_v39  ;;  %v2927_v39 = vld [vmem:[%s3046_s23] sm:$0xff] }
 0x3bb   : > { %2890 = vtanh.f32 %v1310_v40  ;;  %v2448_v42 = vpop.f32.mrb[64].mxu1  ;;  %2515 = vmatmul.mubr.f32.gmra.mrb[56].mxu0 %v2881_v41 }
 0x3bc   : > { %2892 = vtanh.f32 %v1315_v38  ;;  %v1325_v44 = vadd.f32 %v2448_v42, %v3431_v61  ;;  %v1319_v45 = vpop.f32.mrb[65].mxu1  ;;  %v2926_v38 = vld [vmem:[%s3046_s23 + $0x8] sm:$0xff] }
 0x3bd   : > { %v2883_v46 = vpop.eup %2882  ;;  %v1320_v35 = vadd.f32 %v3431_v61, %v1319_v45 }
 0x3be   : > { %v2885_v47 = vpop.eup %2884  ;;  %2517 = vmatprep.mubr.f32.mxu0 %v2883_v46 }
 0x3bf   : > { %2894 = vtanh.f32 %v1320_v35  ;;  %v2451_v48 = vpop.f32.mrb[66].mxu1  ;;  %2518 = vmatmul.mubr.f32.gmra.mrb[58].mxu0 %v2885_v47 }
 0x3c0   : > { %2896 = vtanh.f32 %v1325_v44  ;;  %v1335_v49 = vadd.f32 %v2451_v48, %v3431_v61  ;;  %v1329_v43 = vpop.f32.mrb[67].mxu1  ;;  %v2928_v48 = vld [vmem:[%s3046_s23 + $0x18] sm:$0xff] }
 0x3c1   : > { %v2887_v50 = vpop.eup %2886  ;;  %v1330_v52 = vadd.f32 %v3431_v61, %v1329_v43 }
 0x3c2   : > { %v2889_v53 = vpop.eup %2888  ;;  %2520 = vmatprep.mubr.f32.mxu0 %v2887_v50  ;;  %v2929_v50 = vld [vmem:[%s3046_s23 + $0x10] sm:$0xff] }
 0x3c3   : > { %2898 = vtanh.f32 %v1330_v52  ;;  %v2454_v51 = vpop.f32.mrb[68].mxu1  ;;  %2521 = vmatmul.mubr.f32.gmra.mrb[60].mxu0 %v2889_v53 }
 0x3c4   : > { %2900 = vtanh.f32 %v1335_v49  ;;  %v1345_v54 = vadd.f32 %v2454_v51, %v3431_v61  ;;  %v1339_v55 = vpop.f32.mrb[69].mxu1 }
 0x3c5   : > { %v2891_v56 = vpop.eup %2890  ;;  %v1340_v57 = vadd.f32 %v3431_v61, %v1339_v55 }
 0x3c6   : > { %v2893_v58 = vpop.eup %2892  ;;  %2523 = vmatprep.mubr.f32.mxu0 %v2891_v56 }
 0x3c7   : > { %2902 = vtanh.f32 %v1340_v57  ;;  %v2457_v23 = vpop.f32.mrb[70].mxu1  ;;  %2524 = vmatmul.mubr.f32.gmra.mrb[62].mxu0 %v2893_v58 }
 0x3c8   : > { %2904 = vtanh.f32 %v1345_v54  ;;  %v1355_v59 = vadd.f32 %v2457_v23, %v3431_v61  ;;  %v1349_v60 = vpop.f32.mrb[71].mxu1  ;;  %v2930_v23 = vld [vmem:[%s3046_s23 + $0x28] sm:$0xff] }
 0x3c9   : > { %v2895_v62 = vpop.eup %2894  ;;  %v1350_v63 = vadd.f32 %v3431_v61, %v1349_v60 }
 0x3ca   : > { %v2897_v0 = vpop.eup %2896  ;;  %2526 = vmatprep.mubr.f32.mxu0 %v2895_v62  ;;  %v2931_v62 = vld [vmem:[%s3046_s23 + $0x20] sm:$0xff] }
 0x3cb   : > { %2906 = vtanh.f32 %v1350_v63  ;;  %v2460_v30 = vpop.f32.mrb[72].mxu1  ;;  %2527 = vmatmul.mubr.f32.gmra.mrb[64].mxu0 %v2897_v0 }
 0x3cc   : > { %2908 = vtanh.f32 %v1355_v59  ;;  %v1365_v1 = vadd.f32 %v2460_v30, %v3431_v61  ;;  %v1359_v2 = vpop.f32.mrb[73].mxu1 }
 0x3cd   : > { %v2899_v3 = vpop.eup %2898  ;;  %v1360_v4 = vadd.f32 %v3431_v61, %v1359_v2 }
 0x3ce   : > { %v2901_v31 = vpop.eup %2900  ;;  %2529 = vmatprep.mubr.f32.mxu0 %v2899_v3 }
 0x3cf   : > { %2910 = vtanh.f32 %v1360_v4  ;;  %v2463_v5 = vpop.f32.mrb[74].mxu1  ;;  %2530 = vmatmul.mubr.f32.gmra.mrb[66].mxu0 %v2901_v31 }
 0x3d0   : > { %2912 = vtanh.f32 %v1365_v1  ;;  %v1375_v6 = vadd.f32 %v2463_v5, %v3431_v61  ;;  %v1369_v7 = vpop.f32.mrb[75].mxu1  ;;  %v2932_v5 = vld [vmem:[%s3046_s23 + $0x38] sm:$0xff] }
 0x3d1   : > { %v2903_v8 = vpop.eup %2902  ;;  %v1370_v9 = vadd.f32 %v3431_v61, %v1369_v7 }
 0x3d2   : > { %v2905_v10 = vpop.eup %2904  ;;  %2532 = vmatprep.mubr.f32.mxu0 %v2903_v8  ;;  %v2933_v8 = vld [vmem:[%s3046_s23 + $0x30] sm:$0xff] }
 0x3d3   : > { %2914 = vtanh.f32 %v1370_v9  ;;  %v2466_v11 = vpop.f32.mrb[76].mxu1  ;;  %2533 = vmatmul.mubr.f32.gmra.mrb[68].mxu0 %v2905_v10 }
 0x3d4   : > { %2916 = vtanh.f32 %v1375_v6  ;;  %v1385_v12 = vadd.f32 %v2466_v11, %v3431_v61  ;;  %v1379_v13 = vpop.f32.mrb[77].mxu1 }
 0x3d5   : > { %v2907_v14 = vpop.eup %2906  ;;  %v1380_v15 = vadd.f32 %v3431_v61, %v1379_v13 }
 0x3d6   : > { %v2909_v16 = vpop.eup %2908  ;;  %2535 = vmatprep.mubr.f32.mxu0 %v2907_v14 }
 0x3d7   : > { %2918 = vtanh.f32 %v1380_v15  ;;  %v2469_v17 = vpop.f32.mrb[78].mxu1  ;;  %2536 = vmatmul.mubr.f32.gmra.mrb[70].mxu0 %v2909_v16 }
 0x3d8   : > { %2920 = vtanh.f32 %v1385_v12  ;;  %v1395_v18 = vadd.f32 %v2469_v17, %v3431_v61  ;;  %v1389_v19 = vpop.f32.mrb[79].mxu1  ;;  %v2934_v17 = vld [vmem:[%s3046_s23 + $0x48] sm:$0xff] }
 0x3d9   : > { %v2911_v20 = vpop.eup %2910  ;;  %v1390_v21 = vadd.f32 %v3431_v61, %v1389_v19  ;;  %v3468_v61 = vld [vmem:[%s3582_s6] ss:$0 sm:$0xff] }
 0x3da   : > { %v2913_v22 = vpop.eup %2912  ;;  %2538 = vmatprep.mubr.f32.mxu0 %v2911_v20  ;;  %v2935_v20 = vld [vmem:[%s3046_s23 + $0x40] sm:$0xff] }
 0x3db   : > { %2922 = vtanh.f32 %v1390_v21  ;;  %2539 = vmatmul.mubr.f32.gmra.mrb[72].mxu0 %v2913_v22 }
 0x3dc   : > { %2924 = vtanh.f32 %v1395_v18 }
 0x3dd   : > { %v2915_v24 = vpop.eup %2914 }
 0x3de   : > { %v2917_v25 = vpop.eup %2916  ;;  %2541 = vmatprep.mubr.f32.mxu0 %v2915_v24 }
 0x3df   : > { %2542 = vmatmul.mubr.f32.gmra.mrb[74].mxu0 %v2917_v25 }
 0x3e1   : > { %v2919_v26 = vpop.eup %2918 }
 0x3e2   : > { %v2921_v27 = vpop.eup %2920  ;;  %2544 = vmatprep.mubr.f32.mxu0 %v2919_v26 }
 0x3e3   : > { %2545 = vmatmul.mubr.f32.gmra.mrb[76].mxu0 %v2921_v27 }
 0x3e5   : > { %v2923_v28 = vpop.eup %2922 }
 0x3e6   : > { %v2925_v29 = vpop.eup %2924  ;;  %2547 = vmatprep.mubr.f32.mxu0 %v2923_v28 }
 0x3e7   : > { %2548 = vmatmul.mubr.f32.gmra.mrb[78].mxu0 %v2925_v29 }
 0x47e   : > { %v2504_v32 = vpop.f32.mrb[48].mxu0 }
 0x47f   : > { %v1525_v33 = vadd.f32 %v2504_v32, %v3468_v61  ;;  %v1519_v34 = vpop.f32.mrb[49].mxu0  ;;  %v2936_v32 = vld [vmem:[%s3046_s23 + $0x58] sm:$0xff] }
 0x480   : > { %v1520_v36 = vadd.f32 %v3468_v61, %v1519_v34 }
 0x481   : > { %v1679_v37 = vadd.f32 %v2926_v38, %v1525_v33 }
 0x482   : > { %v1678_v40 = vadd.f32 %v2927_v39, %v1520_v36  ;;  %v2507_v41 = vpop.f32.mrb[50].mxu0  ;;  %v2937_v36 = vld [vmem:[%s3046_s23 + $0x50] sm:$0xff] }
 0x483   : > { %v1711_v42 = vmax.f32 %v1679_v37, 0.0  ;;  %v1535_v44 = vadd.f32 %v2507_v41, %v3468_v61  ;;  %v1529_v45 = vpop.f32.mrb[51].mxu0 }
 0x484   : > { %v1710_v46 = vmax.f32 %v1678_v40, 0.0  ;;  %v1530_v35 = vadd.f32 %v3468_v61, %v1529_v45 }
 0x485   : > { %v1743_v47 = vmin.f32 %v1711_v42, 1.0  ;;  %v1681_v49 = vadd.f32 %v2928_v48, %v1535_v44  ;;  %v2939_v48 = vld [vmem:[%s3046_s23 + $0x60] sm:$0xff] }
 0x486   : > { %v1742_v43 = vmin.f32 %v1710_v46, 1.0  ;;  %v1680_v52 = vadd.f32 %v2929_v50, %v1530_v35  ;;  %v2510_v53 = vpop.f32.mrb[52].mxu0  ;;  %v2938_v46 = vld [vmem:[%s3046_s23 + $0x68] sm:$0xff] }
 0x487   : > { %1775 = vst [vmem:[%s3480_s29 + $0x8] sm:$0xff] %v1743_v47  ;;  %v1713_v51 = vmax.f32 %v1681_v49, 0.0  ;;  %v1545_v54 = vadd.f32 %v2510_v53, %v3468_v61  ;;  %v1539_v55 = vpop.f32.mrb[53].mxu0 }
 0x488   : > { %1774 = vst [vmem:[%s3480_s29] sm:$0xff] %v1742_v43  ;;  %v1712_v56 = vmax.f32 %v1680_v52, 0.0  ;;  %v1540_v57 = vadd.f32 %v3468_v61, %v1539_v55 }
 0x489   : > { %v1745_v58 = vmin.f32 %v1713_v51, 1.0  ;;  %v1683_v59 = vadd.f32 %v2930_v23, %v1545_v54  ;;  %v2941_v23 = vld [vmem:[%s3046_s23 + $0x70] sm:$0xff] }
 0x48a   : > { %v1744_v60 = vmin.f32 %v1712_v56, 1.0  ;;  %v1682_v63 = vadd.f32 %v2931_v62, %v1540_v57  ;;  %v2513_v0 = vpop.f32.mrb[54].mxu0  ;;  %v2940_v56 = vld [vmem:[%s3046_s23 + $0x78] sm:$0xff] }
 0x48b   : > { %1777 = vst [vmem:[%s3480_s29 + $0x18] sm:$0xff] %v1745_v58  ;;  %v1715_v30 = vmax.f32 %v1683_v59, 0.0  ;;  %v1555_v1 = vadd.f32 %v2513_v0, %v3468_v61  ;;  %v1549_v2 = vpop.f32.mrb[55].mxu0 }
 0x48c   : > { %1776 = vst [vmem:[%s3480_s29 + $0x10] sm:$0xff] %v1744_v60  ;;  %v1714_v3 = vmax.f32 %v1682_v63, 0.0  ;;  %v1550_v4 = vadd.f32 %v3468_v61, %v1549_v2 }
 0x48d   : > { %v1747_v31 = vmin.f32 %v1715_v30, 1.0  ;;  %v1685_v6 = vadd.f32 %v2932_v5, %v1555_v1  ;;  %v2943_v5 = vld [vmem:[%s3046_s23 + $0x80] sm:$0xff] }
 0x48e   : > { %v1746_v7 = vmin.f32 %v1714_v3, 1.0  ;;  %v1684_v9 = vadd.f32 %v2933_v8, %v1550_v4  ;;  %v2516_v10 = vpop.f32.mrb[56].mxu0  ;;  %v2942_v3 = vld [vmem:[%s3046_s23 + $0x88] sm:$0xff] }
 0x48f   : > { %1779 = vst [vmem:[%s3480_s29 + $0x28] sm:$0xff] %v1747_v31  ;;  %v1717_v11 = vmax.f32 %v1685_v6, 0.0  ;;  %v1565_v12 = vadd.f32 %v2516_v10, %v3468_v61  ;;  %v1559_v13 = vpop.f32.mrb[57].mxu0 }
 0x490   : > { %1778 = vst [vmem:[%s3480_s29 + $0x20] sm:$0xff] %v1746_v7  ;;  %v1716_v14 = vmax.f32 %v1684_v9, 0.0  ;;  %v1560_v15 = vadd.f32 %v3468_v61, %v1559_v13 }
 0x491   : > { %v1749_v16 = vmin.f32 %v1717_v11, 1.0  ;;  %v1687_v18 = vadd.f32 %v2934_v17, %v1565_v12  ;;  %v2945_v17 = vld [vmem:[%s3046_s23 + $0x90] sm:$0xff] }
 0x492   : > { %v1748_v19 = vmin.f32 %v1716_v14, 1.0  ;;  %v1686_v21 = vadd.f32 %v2935_v20, %v1560_v15  ;;  %v2519_v22 = vpop.f32.mrb[58].mxu0  ;;  %v2944_v14 = vld [vmem:[%s3046_s23 + $0x98] sm:$0xff] }
 0x493   : > { %1781 = vst [vmem:[%s3480_s29 + $0x38] sm:$0xff] %v1749_v16  ;;  %v1719_v24 = vmax.f32 %v1687_v18, 0.0  ;;  %v1575_v25 = vadd.f32 %v2519_v22, %v3468_v61  ;;  %v1569_v26 = vpop.f32.mrb[59].mxu0 }
 0x494   : > { %1780 = vst [vmem:[%s3480_s29 + $0x30] sm:$0xff] %v1748_v19  ;;  %v1718_v27 = vmax.f32 %v1686_v21, 0.0  ;;  %v1570_v28 = vadd.f32 %v3468_v61, %v1569_v26 }
 0x495   : > { %v1751_v29 = vmin.f32 %v1719_v24, 1.0  ;;  %v1689_v33 = vadd.f32 %v2936_v32, %v1575_v25  ;;  %v2947_v32 = vld [vmem:[%s3046_s23 + $0xa0] sm:$0xff] }
 0x496   : > { %v1750_v34 = vmin.f32 %v1718_v27, 1.0  ;;  %v1688_v38 = vadd.f32 %v2937_v36, %v1570_v28  ;;  %v2522_v37 = vpop.f32.mrb[60].mxu0  ;;  %v2946_v27 = vld [vmem:[%s3046_s23 + $0xa8] sm:$0xff] }
 0x497   : > { %1783 = vst [vmem:[%s3480_s29 + $0x48] sm:$0xff] %v1751_v29  ;;  %v1721_v39 = vmax.f32 %v1689_v33, 0.0  ;;  %v1585_v40 = vadd.f32 %v2522_v37, %v3468_v61  ;;  %v1579_v41 = vpop.f32.mrb[61].mxu0 }
 0x498   : > { %1782 = vst [vmem:[%s3480_s29 + $0x40] sm:$0xff] %v1750_v34  ;;  %v1720_v42 = vmax.f32 %v1688_v38, 0.0  ;;  %v1580_v44 = vadd.f32 %v3468_v61, %v1579_v41 }
 0x499   : > { %v1753_v45 = vmin.f32 %v1721_v39, 1.0  ;;  %v1691_v35 = vadd.f32 %v2938_v46, %v1585_v40  ;;  %v2949_v46 = vld [vmem:[%s3046_s23 + $0xb0] sm:$0xff] }
 0x49a   : > { %v1752_v47 = vmin.f32 %v1720_v42, 1.0  ;;  %v1690_v49 = vadd.f32 %v2939_v48, %v1580_v44  ;;  %v2525_v43 = vpop.f32.mrb[62].mxu0  ;;  %v2948_v42 = vld [vmem:[%s3046_s23 + $0xb8] sm:$0xff] }
 0x49b   : > { %1785 = vst [vmem:[%s3480_s29 + $0x58] sm:$0xff] %v1753_v45  ;;  %v1723_v50 = vmax.f32 %v1691_v35, 0.0  ;;  %v1595_v52 = vadd.f32 %v2525_v43, %v3468_v61  ;;  %v1589_v53 = vpop.f32.mrb[63].mxu0 }
 0x49c   : > { %1784 = vst [vmem:[%s3480_s29 + $0x50] sm:$0xff] %v1752_v47  ;;  %v1722_v51 = vmax.f32 %v1690_v49, 0.0  ;;  %v1590_v54 = vadd.f32 %v3468_v61, %v1589_v53 }
 0x49d   : > { %v1755_v55 = vmin.f32 %v1723_v50, 1.0  ;;  %v1693_v57 = vadd.f32 %v2940_v56, %v1595_v52  ;;  %v2951_v56 = vld [vmem:[%s3046_s23 + $0xc0] sm:$0xff] }
 0x49e   : > { %v1754_v58 = vmin.f32 %v1722_v51, 1.0  ;;  %v1692_v59 = vadd.f32 %v2941_v23, %v1590_v54  ;;  %v2528_v60 = vpop.f32.mrb[64].mxu0  ;;  %v2950_v51 = vld [vmem:[%s3046_s23 + $0xc8] sm:$0xff] }
 0x49f   : > { %1787 = vst [vmem:[%s3480_s29 + $0x68] sm:$0xff] %v1755_v55  ;;  %v1725_v62 = vmax.f32 %v1693_v57, 0.0  ;;  %v1605_v63 = vadd.f32 %v2528_v60, %v3468_v61  ;;  %v1599_v0 = vpop.f32.mrb[65].mxu0 }
 0x4a0   : > { %1786 = vst [vmem:[%s3480_s29 + $0x60] sm:$0xff] %v1754_v58  ;;  %v1724_v30 = vmax.f32 %v1692_v59, 0.0  ;;  %v1600_v1 = vadd.f32 %v3468_v61, %v1599_v0 }
 0x4a1   : > { %v1757_v2 = vmin.f32 %v1725_v62, 1.0  ;;  %v1695_v4 = vadd.f32 %v2942_v3, %v1605_v63  ;;  %v2953_v3 = vld [vmem:[%s3046_s23 + $0xd0] sm:$0xff] }
 0x4a2   : > { %v1756_v31 = vmin.f32 %v1724_v30, 1.0  ;;  %v1694_v6 = vadd.f32 %v2943_v5, %v1600_v1  ;;  %v2531_v7 = vpop.f32.mrb[66].mxu0  ;;  %v2952_v30 = vld [vmem:[%s3046_s23 + $0xd8] sm:$0xff] }
 0x4a3   : > { %1789 = vst [vmem:[%s3480_s29 + $0x78] sm:$0xff] %v1757_v2  ;;  %v1727_v8 = vmax.f32 %v1695_v4, 0.0  ;;  %v1615_v9 = vadd.f32 %v2531_v7, %v3468_v61  ;;  %v1609_v10 = vpop.f32.mrb[67].mxu0 }
 0x4a4   : > { %1788 = vst [vmem:[%s3480_s29 + $0x70] sm:$0xff] %v1756_v31  ;;  %v1726_v11 = vmax.f32 %v1694_v6, 0.0  ;;  %v1610_v12 = vadd.f32 %v3468_v61, %v1609_v10 }
 0x4a5   : > { %v1759_v13 = vmin.f32 %v1727_v8, 1.0  ;;  %v1697_v15 = vadd.f32 %v2944_v14, %v1615_v9  ;;  %v2955_v14 = vld [vmem:[%s3046_s23 + $0xe0] sm:$0xff] }
 0x4a6   : > { %v1758_v16 = vmin.f32 %v1726_v11, 1.0  ;;  %v1696_v18 = vadd.f32 %v2945_v17, %v1610_v12  ;;  %v2534_v19 = vpop.f32.mrb[68].mxu0  ;;  %v2954_v11 = vld [vmem:[%s3046_s23 + $0xe8] sm:$0xff] }
 0x4a7   : > { %1791 = vst [vmem:[%s3480_s29 + $0x88] sm:$0xff] %v1759_v13  ;;  %v1729_v20 = vmax.f32 %v1697_v15, 0.0  ;;  %v1625_v21 = vadd.f32 %v2534_v19, %v3468_v61  ;;  %v1619_v22 = vpop.f32.mrb[69].mxu0 }
 0x4a8   : > { %1790 = vst [vmem:[%s3480_s29 + $0x80] sm:$0xff] %v1758_v16  ;;  %v1728_v24 = vmax.f32 %v1696_v18, 0.0  ;;  %v1620_v25 = vadd.f32 %v3468_v61, %v1619_v22 }
 0x4a9   : > { %v1761_v26 = vmin.f32 %v1729_v20, 1.0  ;;  %v1699_v28 = vadd.f32 %v2946_v27, %v1625_v21  ;;  %v2957_v27 = vld [vmem:[%s3046_s23 + $0xf0] sm:$0xff] }
 0x4aa   : > { %v1760_v29 = vmin.f32 %v1728_v24, 1.0  ;;  %v1698_v33 = vadd.f32 %v2947_v32, %v1620_v25  ;;  %v2537_v34 = vpop.f32.mrb[70].mxu0  ;;  %v2956_v24 = vld [vmem:[%s3046_s23 + $0xf8] sm:$0xff] }
 0x4ab   : > { %1793 = vst [vmem:[%s3480_s29 + $0x98] sm:$0xff] %v1761_v26  ;;  %v1731_v36 = vmax.f32 %v1699_v28, 0.0  ;;  %v1635_v38 = vadd.f32 %v2537_v34, %v3468_v61  ;;  %v1629_v37 = vpop.f32.mrb[71].mxu0 }
 0x4ac   : > { %1792 = vst [vmem:[%s3480_s29 + $0x90] sm:$0xff] %v1760_v29  ;;  %v1730_v39 = vmax.f32 %v1698_v33, 0.0  ;;  %v1630_v40 = vadd.f32 %v3468_v61, %v1629_v37 }
 0x4ad   : > { %v1763_v41 = vmin.f32 %v1731_v36, 1.0  ;;  %v1701_v44 = vadd.f32 %v2948_v42, %v1635_v38 }
 0x4ae   : > { %v1762_v45 = vmin.f32 %v1730_v39, 1.0  ;;  %v1700_v35 = vadd.f32 %v2949_v46, %v1630_v40  ;;  %v2540_v47 = vpop.f32.mrb[72].mxu0 }
 0x4af   : > { %1795 = vst [vmem:[%s3480_s29 + $0xa8] sm:$0xff] %v1763_v41  ;;  %v1733_v48 = vmax.f32 %v1701_v44, 0.0  ;;  %v1645_v49 = vadd.f32 %v2540_v47, %v3468_v61  ;;  %v1639_v43 = vpop.f32.mrb[73].mxu0 }
 0x4b0   : > { %1794 = vst [vmem:[%s3480_s29 + $0xa0] sm:$0xff] %v1762_v45  ;;  %v1732_v50 = vmax.f32 %v1700_v35, 0.0  ;;  %v1640_v52 = vadd.f32 %v3468_v61, %v1639_v43 }
 0x4b1   : > { %v1765_v53 = vmin.f32 %v1733_v48, 1.0  ;;  %v1703_v54 = vadd.f32 %v2950_v51, %v1645_v49 }
 0x4b2   : > { %v1764_v55 = vmin.f32 %v1732_v50, 1.0  ;;  %v1702_v57 = vadd.f32 %v2951_v56, %v1640_v52  ;;  %v2543_v58 = vpop.f32.mrb[74].mxu0 }
 0x4b3   : > { %1797 = vst [vmem:[%s3480_s29 + $0xb8] sm:$0xff] %v1765_v53  ;;  %v1735_v23 = vmax.f32 %v1703_v54, 0.0  ;;  %v1655_v59 = vadd.f32 %v2543_v58, %v3468_v61  ;;  %v1649_v60 = vpop.f32.mrb[75].mxu0 }
 0x4b4   : > { %1796 = vst [vmem:[%s3480_s29 + $0xb0] sm:$0xff] %v1764_v55  ;;  %v1734_v62 = vmax.f32 %v1702_v57, 0.0  ;;  %v1650_v63 = vadd.f32 %v3468_v61, %v1649_v60 }
 0x4b5   : > { %v1767_v0 = vmin.f32 %v1735_v23, 1.0  ;;  %v1705_v1 = vadd.f32 %v2952_v30, %v1655_v59 }
 0x4b6   : > { %v1766_v2 = vmin.f32 %v1734_v62, 1.0  ;;  %v1704_v4 = vadd.f32 %v2953_v3, %v1650_v63  ;;  %v2546_v31 = vpop.f32.mrb[76].mxu0 }
 0x4b7   : > { %1799 = vst [vmem:[%s3480_s29 + $0xc8] sm:$0xff] %v1767_v0  ;;  %v1737_v5 = vmax.f32 %v1705_v1, 0.0  ;;  %v1665_v6 = vadd.f32 %v2546_v31, %v3468_v61  ;;  %v1659_v7 = vpop.f32.mrb[77].mxu0 }
 0x4b8   : > { %1798 = vst [vmem:[%s3480_s29 + $0xc0] sm:$0xff] %v1766_v2  ;;  %v1736_v8 = vmax.f32 %v1704_v4, 0.0  ;;  %v1660_v9 = vadd.f32 %v3468_v61, %v1659_v7 }
 0x4b9   : > { %v1769_v10 = vmin.f32 %v1737_v5, 1.0  ;;  %v1707_v12 = vadd.f32 %v2954_v11, %v1665_v6 }
 0x4ba   : > { %v1768_v13 = vmin.f32 %v1736_v8, 1.0  ;;  %v1706_v15 = vadd.f32 %v2955_v14, %v1660_v9  ;;  %v2549_v16 = vpop.f32.mrb[78].mxu0 }
 0x4bb   : > { %1801 = vst [vmem:[%s3480_s29 + $0xd8] sm:$0xff] %v1769_v10  ;;  %v1739_v17 = vmax.f32 %v1707_v12, 0.0  ;;  %v1675_v18 = vadd.f32 %v2549_v16, %v3468_v61  ;;  %v1669_v19 = vpop.f32.mrb[79].mxu0 }
 0x4bc   : > { %1800 = vst [vmem:[%s3480_s29 + $0xd0] sm:$0xff] %v1768_v13  ;;  %v1738_v20 = vmax.f32 %v1706_v15, 0.0  ;;  %v1670_v21 = vadd.f32 %v3468_v61, %v1669_v19 }
 0x4bd   : > { %v1771_v22 = vmin.f32 %v1739_v17, 1.0  ;;  %v1709_v25 = vadd.f32 %v2956_v24, %v1675_v18 }
 0x4be   : > { %v1770_v26 = vmin.f32 %v1738_v20, 1.0  ;;  %v1708_v28 = vadd.f32 %v2957_v27, %v1670_v21 }
 0x4bf   : > { %1803 = vst [vmem:[%s3480_s29 + $0xe8] sm:$0xff] %v1771_v22  ;;  %v1741_v29 = vmax.f32 %v1709_v25, 0.0 }
 0x4c0   : > { %1802 = vst [vmem:[%s3480_s29 + $0xe0] sm:$0xff] %v1770_v26  ;;  %v1740_v32 = vmax.f32 %v1708_v28, 0.0 }
 0x4c1   : > { %v1773_v33 = vmin.f32 %v1741_v29, 1.0 }
 0x4c2   : > { %v1772_v34 = vmin.f32 %v1740_v32, 1.0 }
 0x4c3   : > { %1805 = vst [vmem:[%s3480_s29 + $0xf8] sm:$0xff] %v1773_v33 }
 0x4c4   : > { %1804 = vst [vmem:[%s3480_s29 + $0xf0] sm:$0xff] %v1772_v34 }
 0x4c5 PF: > { %s17_s24 = sadd.s32 1, %s2964_s24  }
 0x4c6   : > { %p14_p4 = scmp.ge.s32.totalorder %s17_s24, 4  }
 0x4c8   :  { %16 = sbr.rel (!%p14_p4) target bundleno = 1 (0x1), region = 80 }

</bundles_post_ra>
